<compile_context>
chip_gen: v5e
topology: v5e:2x2
jax: 0.10.0
libtpu: 0.0.40
codegen_flags: <defaults>
</compile_context>

<pallas_src>
import functools

import jax
import jax.numpy as jnp
from jax import lax
from jax.experimental import pallas as pl
from jax.experimental.pallas import tpu as pltpu

# "A @ B.T" contraction (transposed RHS), as used by the TPU flash-attention
# kernel for q @ k.T.  Folds the x relayout into the MXU feed.
_NT_DIMS = (((1,), (1,)), ((), ()))


def _mlp_kernel(x_ref, w1_ref, b1_ref, w2_ref, b2_ref, w3_ref, b3_ref, o_ref,
                *, tc):
    """One grid step: (tb, 3) batch rows -> (1, tb) sigmoid outputs.

    All intermediates keep the batch on the LANE axis; the tile is processed
    in `tc`-lane sub-chunks so vreg pressure stays bounded at large tb.
    """
    tb = o_ref.shape[-1]
    w1 = w1_ref[...]          # (32, 3)
    b1 = b1_ref[...]          # (32, 1)
    w2 = w2_ref[...]          # (16, 32)
    b2 = b2_ref[...]          # (16, 1)
    w3 = w3_ref[...]          # (16, 1)  (fc3 weight as a column)
    b3 = b3_ref[...]          # (1, 1)

    hp = lax.Precision.HIGHEST

    for c in range(tb // tc):                      # static chunk loop
        lo = c * tc
        xc = x_ref[lo:lo + tc, :]                  # (tc, 3), batch on sublanes

        # Layer 1 on the MXU with a transposed-RHS contraction: relays x to
        # batch-on-lanes for free on the (otherwise idle) MXU; K=3 padding
        # waste is irrelevant since the MXU has huge slack here.
        h1 = lax.dot_general(w1, xc, _NT_DIMS, precision=hp,
                             preferred_element_type=jnp.float32)   # (32, tc)
        h1 = jnp.maximum(h1 + b1, 0.0)

        # Layer 2: dominant contraction (K=32) on the MXU instead of a 32-step
        # VPU broadcast loop.
        h2 = jnp.dot(w2, h1, precision=hp,
                     preferred_element_type=jnp.float32)           # (16, tc)
        h2 = jnp.maximum(h2 + b2, 0.0)

        # Layer 3: elementwise multiply + sublane reduction (XLU) -> (1, tc).
        z = jnp.sum(w3 * h2, axis=0, keepdims=True) + b3

        o_ref[:, lo:lo + tc] = jax.nn.sigmoid(z)   # lane-dense store


def _round_up(n, m):
    return ((n + m - 1) // m) * m


def simple_model_forward(x, params, *, tb=4096, tc=256):
    """Forward pass of SimpleModel.  x: [B, 3] f32; params in PyTorch layout
    (w: [out, in], b: [out]).  Returns [B, 1] f32."""
    w1, b1, w2, b2, w3, b3 = params
    x = x.astype(jnp.float32)
    B = x.shape[0]

    # Batch tile: as large as requested, clamped so tiny batches do not
    # allocate a mostly-empty tile; always a multiple of the inner chunk tc.
    tb = max(tc, _round_up(min(tb, _round_up(B, tc)), tc))
    bp = _round_up(B, tb)
    grid = (bp // tb,)

    # Only a ragged remainder gets padded; tile-aligned production batches take
    # the zero-extra-HBM-traffic path (no transpose pass at all).
    if bp != B:
        x = jnp.pad(x, ((0, bp - B), (0, 0)))

    # Column-vector biases / final weight so every broadcast is along lanes.
    w1 = w1.astype(jnp.float32)                     # (32, 3)
    w2 = w2.astype(jnp.float32)                     # (16, 32)
    b1c = b1.reshape(-1, 1).astype(jnp.float32)     # (32, 1)
    b2c = b2.reshape(-1, 1).astype(jnp.float32)     # (16, 1)
    w3c = w3.reshape(-1, 1).astype(jnp.float32)     # (16, 1)
    b3c = b3.reshape(1, 1).astype(jnp.float32)      # (1, 1)

    resident = lambda a: pl.BlockSpec(a.shape, lambda i: (0, 0))  # weights stay in VMEM

    out = pl.pallas_call(
        functools.partial(_mlp_kernel, tc=tc),
        out_shape=jax.ShapeDtypeStruct((1, bp), jnp.float32),
        grid=grid,
        in_specs=[
            pl.BlockSpec((tb, 3), lambda i: (i, 0)),      # x row-block, features minor (= full dim)
            resident(w1), resident(b1c),
            resident(w2), resident(b2c),
            resident(w3c), resident(b3c),
        ],
        out_specs=pl.BlockSpec((1, tb), lambda i: (0, i)),  # lane-dense output slab
        compiler_params=pltpu.CompilerParams(
            dimension_semantics=("parallel",)),             # both v7x TCs when grid >= 2
    )(x, w1, b1c, w2, b2c, w3c, b3c)

    return out[0, :B].reshape(B, 1)


def init_params(key):
    # nn.Linear-style U(-1/sqrt(fan_in), 1/sqrt(fan_in)) init, PyTorch layout.
    def linear(key, fan_in, fan_out):
        kw, kb = jax.random.split(key)
        bound = 1.0 / jnp.sqrt(fan_in)
        w = jax.random.uniform(kw, (fan_out, fan_in), jnp.float32, -bound, bound)
        b = jax.random.uniform(kb, (fan_out,), jnp.float32, -bound, bound)
        return w, b

    k1, k2, k3 = jax.random.split(key, 3)
    w1, b1 = linear(k1, 3, 32)
    w2, b2 = linear(k2, 32, 16)
    w3, b3 = linear(k3, 16, 1)
    return w1, b1, w2, b2, w3, b3


def reference_forward(x, params):
    w1, b1, w2, b2, w3, b3 = params
    hp = lax.Precision.HIGHEST
    h = jnp.maximum(jnp.dot(x, w1.T, precision=hp) + b1, 0.0)
    h = jnp.maximum(jnp.dot(h, w2.T, precision=hp) + b2, 0.0)
    return jax.nn.sigmoid(jnp.dot(h, w3.T, precision=hp) + b3)


if __name__ == "__main__":
    key = jax.random.PRNGKey(0)
    kp, kx = jax.random.split(key)
    params = init_params(kp)

    # Small, non-tile-aligned batch: exercises the ragged-pad path (1 grid step).
    x_small = jax.random.normal(kx, (300, 3), jnp.float32)
    out_small = jax.block_until_ready(simple_model_forward(x_small, params))
    ref_small = reference_forward(x_small, params)
    assert out_small.shape == (300, 1)
    assert jnp.allclose(out_small, ref_small, atol=1e-5, rtol=1e-5)

    # Aligned batch with tb=1024: exercises a 2-step grid and multi-chunk tiles.
    x_big = jax.random.normal(kx, (2048, 3), jnp.float32)
    out_big = jax.block_until_ready(simple_model_forward(x_big, params, tb=1024))
    ref_big = reference_forward(x_big, params)
    assert out_big.shape == (2048, 1)
    assert jnp.allclose(out_big, ref_big, atol=1e-5, rtol=1e-5)

    print("KERNEL_OK")
</pallas_src>

<mosaic_0001>
module attributes {stable_mosaic.version = 11 : i64} {
  func.func @_mlp_kernel(%arg0: i32, %arg1: memref<512x3xf32, #tpu.memory_space<vmem>>, %arg2: memref<32x3xf32, #tpu.memory_space<vmem>>, %arg3: memref<32x1xf32, #tpu.memory_space<vmem>>, %arg4: memref<16x32xf32, #tpu.memory_space<vmem>>, %arg5: memref<16x1xf32, #tpu.memory_space<vmem>>, %arg6: memref<16x1xf32, #tpu.memory_space<vmem>>, %arg7: memref<1x1xf32, #tpu.memory_space<vmem>>, %arg8: memref<1x512xf32, #tpu.memory_space<vmem>>) attributes {dimension_semantics = [#tpu.dimension_semantics<parallel>], iteration_bounds = array<i64: 1>, scalar_prefetch = 0 : i64, scratch_operands = 0 : i64, tpu.core_type = #tpu.core_type<tc>, window_params = [{transform_indices = @transform_0, window_bounds = array<i64: 512, 3>}, {pipeline_mode = #tpu.pipeline_mode<synchronous>, transform_indices = @transform_1, window_bounds = array<i64: 32, 3>}, {pipeline_mode = #tpu.pipeline_mode<synchronous>, transform_indices = @transform_2, window_bounds = array<i64: 32, 1>}, {pipeline_mode = #tpu.pipeline_mode<synchronous>, transform_indices = @transform_3, window_bounds = array<i64: 16, 32>}, {pipeline_mode = #tpu.pipeline_mode<synchronous>, transform_indices = @transform_4, window_bounds = array<i64: 16, 1>}, {pipeline_mode = #tpu.pipeline_mode<synchronous>, transform_indices = @transform_5, window_bounds = array<i64: 16, 1>}, {pipeline_mode = #tpu.pipeline_mode<synchronous>, transform_indices = @transform_6, window_bounds = array<i64: 1, 1>}, {transform_indices = @transform_7, window_bounds = array<i64: 1, 512>}]} {
    %c0 = arith.constant 0 : index
    %c0_0 = arith.constant 0 : index
    %0 = vector.load %arg2[%c0, %c0_0] : memref<32x3xf32, #tpu.memory_space<vmem>>, vector<32x3xf32>
    %c0_1 = arith.constant 0 : index
    %c0_2 = arith.constant 0 : index
    %1 = vector.load %arg3[%c0_1, %c0_2] : memref<32x1xf32, #tpu.memory_space<vmem>>, vector<32x1xf32>
    %c0_3 = arith.constant 0 : index
    %c0_4 = arith.constant 0 : index
    %2 = vector.load %arg4[%c0_3, %c0_4] : memref<16x32xf32, #tpu.memory_space<vmem>>, vector<16x32xf32>
    %c0_5 = arith.constant 0 : index
    %c0_6 = arith.constant 0 : index
    %3 = vector.load %arg5[%c0_5, %c0_6] : memref<16x1xf32, #tpu.memory_space<vmem>>, vector<16x1xf32>
    %c0_7 = arith.constant 0 : index
    %c0_8 = arith.constant 0 : index
    %4 = vector.load %arg6[%c0_7, %c0_8] : memref<16x1xf32, #tpu.memory_space<vmem>>, vector<16x1xf32>
    %c0_9 = arith.constant 0 : index
    %c0_10 = arith.constant 0 : index
    %5 = vector.load %arg7[%c0_9, %c0_10] : memref<1x1xf32, #tpu.memory_space<vmem>>, vector<1x1xf32>
    %c0_11 = arith.constant 0 : index
    %c0_12 = arith.constant 0 : index
    %6 = vector.load %arg1[%c0_11, %c0_12] : memref<512x3xf32, #tpu.memory_space<vmem>>, vector<256x3xf32>
    %cst = arith.constant dense<0.000000e+00> : vector<32x256xf32>
    %7 = tpu.matmul %0, %6, %cst {dimension_numbers = #tpu.dot_dimension_numbers<[1], [1], [0], [0], [0, 0, 1, 0], [], []>, precision = #tpu.contract_precision<fp32>} : vector<32x3xf32>, vector<256x3xf32>, vector<32x256xf32> -> vector<32x256xf32>
    %8 = vector.broadcast %1 : vector<32x1xf32> to vector<32x256xf32>
    %9 = arith.addf %7, %8 : vector<32x256xf32>
    %cst_13 = arith.constant 0.000000e+00 : f32
    %10 = vector.broadcast %cst_13 : f32 to vector<32x256xf32>
    %11 = arith.maximumf %9, %10 : vector<32x256xf32>
    %cst_14 = arith.constant dense<0.000000e+00> : vector<16x256xf32>
    %12 = tpu.matmul %2, %11, %cst_14 {dimension_numbers = #tpu.dot_dimension_numbers<[1], [0], [0], [1], [0, 0, 1, 1], [], []>, precision = #tpu.contract_precision<fp32>} : vector<16x32xf32>, vector<32x256xf32>, vector<16x256xf32> -> vector<16x256xf32>
    %13 = vector.broadcast %3 : vector<16x1xf32> to vector<16x256xf32>
    %14 = arith.addf %12, %13 : vector<16x256xf32>
    %cst_15 = arith.constant 0.000000e+00 : f32
    %15 = vector.broadcast %cst_15 : f32 to vector<16x256xf32>
    %16 = arith.maximumf %14, %15 : vector<16x256xf32>
    %17 = vector.broadcast %4 : vector<16x1xf32> to vector<16x256xf32>
    %18 = arith.mulf %17, %16 : vector<16x256xf32>
    %cst_16 = arith.constant dense<0.000000e+00> : vector<256xf32>
    %19 = vector.multi_reduction <add>, %18, %cst_16 [0] : vector<16x256xf32> to vector<256xf32>
    %20 = vector.shape_cast %19 : vector<256xf32> to vector<1x256xf32>
    %21 = vector.broadcast %5 : vector<1x1xf32> to vector<1x256xf32>
    %22 = arith.addf %20, %21 : vector<1x256xf32>
    %23 = arith.negf %22 : vector<1x256xf32>
    %24 = math.exp %23 : vector<1x256xf32>
    %cst_17 = arith.constant 1.000000e+00 : f32
    %25 = vector.broadcast %cst_17 : f32 to vector<1x256xf32>
    %26 = arith.addf %25, %24 : vector<1x256xf32>
    %27 = arith.divf %25, %26 : vector<1x256xf32>
    %c0_18 = arith.constant 0 : index
    %c0_19 = arith.constant 0 : index
    %28 = vector.load %arg8[%c0_18, %c0_19] : memref<1x512xf32, #tpu.memory_space<vmem>>, vector<1x256xf32>
    tpu.vector_store %arg8[%c0_18, %c0_19], %27 {strides = array<i32>} : memref<1x512xf32, #tpu.memory_space<vmem>>, vector<1x256xf32>,
    %c256 = arith.constant 256 : index
    %c0_20 = arith.constant 0 : index
    %29 = vector.load %arg1[%c256, %c0_20] : memref<512x3xf32, #tpu.memory_space<vmem>>, vector<256x3xf32>
    %cst_21 = arith.constant dense<0.000000e+00> : vector<32x256xf32>
    %30 = tpu.matmul %0, %29, %cst_21 {dimension_numbers = #tpu.dot_dimension_numbers<[1], [1], [0], [0], [0, 0, 1, 0], [], []>, precision = #tpu.contract_precision<fp32>} : vector<32x3xf32>, vector<256x3xf32>, vector<32x256xf32> -> vector<32x256xf32>
    %31 = vector.broadcast %1 : vector<32x1xf32> to vector<32x256xf32>
    %32 = arith.addf %30, %31 : vector<32x256xf32>
    %cst_22 = arith.constant 0.000000e+00 : f32
    %33 = vector.broadcast %cst_22 : f32 to vector<32x256xf32>
    %34 = arith.maximumf %32, %33 : vector<32x256xf32>
    %cst_23 = arith.constant dense<0.000000e+00> : vector<16x256xf32>
    %35 = tpu.matmul %2, %34, %cst_23 {dimension_numbers = #tpu.dot_dimension_numbers<[1], [0], [0], [1], [0, 0, 1, 1], [], []>, precision = #tpu.contract_precision<fp32>} : vector<16x32xf32>, vector<32x256xf32>, vector<16x256xf32> -> vector<16x256xf32>
    %36 = vector.broadcast %3 : vector<16x1xf32> to vector<16x256xf32>
    %37 = arith.addf %35, %36 : vector<16x256xf32>
    %cst_24 = arith.constant 0.000000e+00 : f32
    %38 = vector.broadcast %cst_24 : f32 to vector<16x256xf32>
    %39 = arith.maximumf %37, %38 : vector<16x256xf32>
    %40 = vector.broadcast %4 : vector<16x1xf32> to vector<16x256xf32>
    %41 = arith.mulf %40, %39 : vector<16x256xf32>
    %cst_25 = arith.constant dense<0.000000e+00> : vector<256xf32>
    %42 = vector.multi_reduction <add>, %41, %cst_25 [0] : vector<16x256xf32> to vector<256xf32>
    %43 = vector.shape_cast %42 : vector<256xf32> to vector<1x256xf32>
    %44 = vector.broadcast %5 : vector<1x1xf32> to vector<1x256xf32>
    %45 = arith.addf %43, %44 : vector<1x256xf32>
    %46 = arith.negf %45 : vector<1x256xf32>
    %47 = math.exp %46 : vector<1x256xf32>
    %cst_26 = arith.constant 1.000000e+00 : f32
    %48 = vector.broadcast %cst_26 : f32 to vector<1x256xf32>
    %49 = arith.addf %48, %47 : vector<1x256xf32>
    %50 = arith.divf %48, %49 : vector<1x256xf32>
    %c0_27 = arith.constant 0 : index
    %c256_28 = arith.constant 256 : index
    %51 = vector.load %arg8[%c0_27, %c256_28] : memref<1x512xf32, #tpu.memory_space<vmem>>, vector<1x256xf32>
    tpu.vector_store %arg8[%c0_27, %c256_28], %50 {strides = array<i32>} : memref<1x512xf32, #tpu.memory_space<vmem>>, vector<1x256xf32>,
    return
  }
  func.func @transform_0(%arg0: i32) -> (i32, i32) {
    %c0_i32 = arith.constant 0 : i32
    %c0_i32_0 = arith.constant 0 : i32
    return %arg0, %c0_i32 : i32, i32
  }
  func.func @transform_1(%arg0: i32) -> (i32, i32) {
    %c0_i32 = arith.constant 0 : i32
    %c0_i32_0 = arith.constant 0 : i32
    %c0_i32_1 = arith.constant 0 : i32
    return %c0_i32, %c0_i32_0 : i32, i32
  }
  func.func @transform_2(%arg0: i32) -> (i32, i32) {
    %c0_i32 = arith.constant 0 : i32
    %c0_i32_0 = arith.constant 0 : i32
    %c0_i32_1 = arith.constant 0 : i32
    return %c0_i32, %c0_i32_0 : i32, i32
  }
  func.func @transform_3(%arg0: i32) -> (i32, i32) {
    %c0_i32 = arith.constant 0 : i32
    %c0_i32_0 = arith.constant 0 : i32
    %c0_i32_1 = arith.constant 0 : i32
    return %c0_i32, %c0_i32_0 : i32, i32
  }
  func.func @transform_4(%arg0: i32) -> (i32, i32) {
    %c0_i32 = arith.constant 0 : i32
    %c0_i32_0 = arith.constant 0 : i32
    %c0_i32_1 = arith.constant 0 : i32
    return %c0_i32, %c0_i32_0 : i32, i32
  }
  func.func @transform_5(%arg0: i32) -> (i32, i32) {
    %c0_i32 = arith.constant 0 : i32
    %c0_i32_0 = arith.constant 0 : i32
    %c0_i32_1 = arith.constant 0 : i32
    return %c0_i32, %c0_i32_0 : i32, i32
  }
  func.func @transform_6(%arg0: i32) -> (i32, i32) {
    %c0_i32 = arith.constant 0 : i32
    %c0_i32_0 = arith.constant 0 : i32
    %c0_i32_1 = arith.constant 0 : i32
    return %c0_i32, %c0_i32_0 : i32, i32
  }
  func.func @transform_7(%arg0: i32) -> (i32, i32) {
    %c0_i32 = arith.constant 0 : i32
    %c0_i32_0 = arith.constant 0 : i32
    return %c0_i32, %arg0 : i32, i32
  }
}

</mosaic_0001>

<bundles_post_ra>
// kernel: tpu_custom_call.1
= control target key start
LH: loop header
LB: loop body
LE: loop exit
PB: predicated region body
PF: predicated region fallthrough
CT: control target
= control target key end

     0   :  { %s4848_s0 = inlined_call_operand.vmem [shape: f32[512,3], index: 0, kind: input, shape index: {}]   ;;  %s4849_s1 = inlined_call_operand.vmem [shape: f32[32,3], index: 1, kind: input, shape index: {}]   ;;  %s4850_s2 = inlined_call_operand.vmem [shape: f32[32,1], index: 2, kind: input, shape index: {}]   ;;  %s4851_s3 = inlined_call_operand.vmem [shape: f32[16,32], index: 3, kind: input, shape index: {}]   ;;  %s4852_s4 = inlined_call_operand.vmem [shape: f32[16,1], index: 4, kind: input, shape index: {}]   ;;  %s4853_s5 = inlined_call_operand.vmem [shape: f32[16,1], index: 5, kind: input, shape index: {}]   ;;  %s4854_s6 = inlined_call_operand.<no memory space> [shape: f32[1,1], index: 6, kind: input, shape index: {}]   ;;  %s4855_s7 = inlined_call_operand.hbm [shape: f32[1,512], index: 7, kind: output, shape index: {}]  }
   0x1   :  { %v12_v0 = vstv %s4854_s6 }
   0x2   :  { %13 = vst [vmem:[#allocation2] sm:$0x1] %v12_v0 }
   0x3   :  { %v59_v1 = vld [vmem:[%s4848_s0 + $0x78] sm:$0xff]  ;;  %vm96_vm0 = vcmask 23552   ;;  %v58_v2 = vld [vmem:[%s4848_s0 + $0x70] sm:$0xff]  ;;  %v57_v3 = vld [vmem:[%s4848_s0 + $0x68] sm:$0xff] }
   0x4   :  { %v155_v4 = vsel %vm96_vm0, %v59_v1, 0  ;;  %v152_v5 = vsel %vm96_vm0, %v58_v2, 0  ;;  %v149_v6 = vsel %vm96_vm0, %v57_v3, 0  ;;  %v56_v7 = vld [vmem:[%s4848_s0 + $0x60] sm:$0xff]  ;;  %v55_v8 = vld [vmem:[%s4848_s0 + $0x58] sm:$0xff]  ;;  %v54_v18 = vld [vmem:[%s4848_s0 + $0x50] sm:$0xff] }
   0x5   :  { %v3253_v9 = vand.u32 4294901760, %v155_v4  ;;  %v3255_v10 = vand.u32 4294901760, %v152_v5  ;;  %v3257_v11 = vand.u32 4294901760, %v149_v6  ;;  %v146_v12 = vsel %vm96_vm0, %v56_v7, 0 }
   0x6   :  { %v3260_v13 = vand.u32 4294901760, %v146_v12  ;;  %v143_v17 = vsel %vm96_vm0, %v55_v8, 0 }
   0x7   :  { %206 = vmatpush.xpose.msra.mxu0 %v3253_v9  ;;  %v3264_v14 = vsub.f32 %v155_v4, %v3253_v9  ;;  %453 = vmatpush.xpose.msra.mxu3 %v3253_v9  ;;  %v3268_v15 = vsub.f32 %v152_v5, %v3255_v10  ;;  %v3271_v16 = vsub.f32 %v149_v6, %v3257_v11 }
   0x8   :  { %14 = vsyncpa [#allocation4], 0  ;;  %v3280_v21 = vand.u32 4294901760, %v143_v17  ;;  %v140_v22 = vsel %vm96_vm0, %v54_v18, 0  ;;  %v3293_v26 = vsub.f32 %v146_v12, %v3260_v13  ;;  %v53_v27 = vld [vmem:[%s4848_s0 + $0x48] sm:$0xff]  ;;  %v52_v35 = vld [vmem:[%s4848_s0 + $0x40] sm:$0xff] }
   0x9   :  { %385 = vmatpush.xpose.msra.mxu2 %v3264_v14  ;;  %v272_v19 = vand.u32 4294901760, %v3264_v14  ;;  %v278_v20 = vand.u32 4294901760, %v3268_v15  ;;  %v284_v25 = vand.u32 4294901760, %v3271_v16  ;;  %v3299_v29 = vand.u32 4294901760, %v140_v22  ;;  %v51_v42 = vld [vmem:[%s4848_s0 + $0x38] sm:$0xff]  ;;  %v50_v49 = vld [vmem:[%s4848_s0 + $0x30] sm:$0xff] }
   0xa   :  { %v137_v30 = vsel %vm96_vm0, %v53_v27, 0  ;;  %v4871_v33 = vand.u32 4294901760, %v3293_v26  ;;  %v3308_v34 = vsub.f32 %v143_v17, %v3280_v21  ;;  %v134_v41 = vsel %vm96_vm0, %v52_v35, 0  ;;  %v49_v55 = vld [vmem:[%s4848_s0 + $0x28] sm:$0xff]  ;;  %v48_v63 = vld [vmem:[%s4848_s0 + $0x20] sm:$0xff]  ;;  %v47_v6 = vld [vmem:[%s4848_s0 + $0x18] sm:$0xff] }
   0xb   :  { %208 = vmatpush.xpose.msra.mxu0 %v3255_v10  ;;  %v273_v23 = vsub.f32 %v3264_v14, %v272_v19  ;;  %455 = vmatpush.xpose.msra.mxu3 %v3255_v10  ;;  %v279_v24 = vsub.f32 %v3268_v15, %v278_v20  ;;  %v285_v32 = vsub.f32 %v3271_v16, %v284_v25  ;;  %v3315_v36 = vand.u32 4294901760, %v137_v30  ;;  %s3130_s25 = sshll.u32 %s4855_s7, 4  ;;  %s3131_s25 = int_to_ptr.hbm [resolvable:$true] %s3130_s25 }
   0xc   :  { %v291_v38 = vsub.f32 %v3293_v26, %v4871_v33  ;;  %v4870_v39 = vand.u32 4294901760, %v3308_v34  ;;  %v3323_v40 = vsub.f32 %v140_v22, %v3299_v29  ;;  %v3338_v46 = vand.u32 4294901760, %v134_v41 }
   0xd   :  { %v274_v28 = vand.u32 4294901760, %v273_v23  ;;  %388 = vmatpush.xpose.msra.mxu2 %v3268_v15  ;;  %v280_v31 = vand.u32 4294901760, %v279_v24  ;;  %v286_v37 = vand.u32 4294901760, %v285_v32  ;;  %v3332_v43 = vsub.f32 %v137_v30, %v3315_v36  ;;  %v46_v23 = vld [vmem:[%s4848_s0 + $0x10] sm:$0xff]  ;;  %v75_v32 = vld [vmem:[%s4848_s0 + $0xf8] sm:$0xff] }
   0xe   :  { %v292_v44 = vand.u32 4294901760, %v291_v38  ;;  %v297_v45 = vsub.f32 %v3308_v34, %v4870_v39  ;;  %v4869_v47 = vand.u32 4294901760, %v3323_v40  ;;  %v131_v48 = vsel %vm96_vm0, %v51_v42, 0  ;;  %v74_v42 = vld [vmem:[%s4848_s0 + $0xf0] sm:$0xff] }
   0xf   :  { %210 = vmatpush.xpose.msra.mxu0 %v3257_v11  ;;  %275 = vmatpush.xpose.msra.mxu1 %v274_v28  ;;  %v4868_v50 = vand.u32 4294901760, %v3332_v43  ;;  %v3352_v53 = vand.u32 4294901760, %v131_v48  ;;  %v3355_v54 = vsub.f32 %v134_v41, %v3338_v46  ;;  %v128_v56 = vsel %vm96_vm0, %v50_v49, 0 }
  0x10   :  { %457 = vmatpush.xpose.msra.mxu3 %v3257_v11  ;;  %v298_v51 = vand.u32 4294901760, %v297_v45  ;;  %v303_v52 = vsub.f32 %v3323_v40, %v4869_v47  ;;  %v125_v58 = vsel %vm96_vm0, %v49_v55, 0  ;;  %v3368_v60 = vand.u32 4294901760, %v128_v56 }
  0x11   :  { %391 = vmatpush.xpose.msra.mxu2 %v3271_v16  ;;  %v309_v57 = vsub.f32 %v3332_v43, %v4868_v50  ;;  %v4864_v61 = vand.u32 4294901760, %v3355_v54  ;;  %v3372_v62 = vsub.f32 %v131_v48, %v3352_v53  ;;  %v3379_v1 = vand.u32 4294901760, %v125_v58 }
  0x12   :  { %v304_v59 = vand.u32 4294901760, %v303_v52  ;;  %v3387_v4 = vsub.f32 %v128_v56, %v3368_v60  ;;  %v122_v5 = vsel %vm96_vm0, %v48_v63, 0  ;;  %v119_v22 = vsel %vm96_vm0, %v47_v6, 0  ;;  %v44_v52 = vld [vmem:[%s4848_s0] sm:$0xff] }
  0x13   :  { %212 = vmatpush.xpose.msra.mxu0 %v3260_v13  ;;  %281 = vmatpush.xpose.msra.mxu1 %v280_v31  ;;  %v310_v0 = vand.u32 4294901760, %v309_v57  ;;  %v315_v2 = vsub.f32 %v3355_v54, %v4864_v61  ;;  %v4863_v3 = vand.u32 4294901760, %v3372_v62  ;;  %v3395_v7 = vand.u32 4294901760, %v122_v5  ;;  %v69_v61 = vld [vmem:[%s4848_s0 + $0xc8] sm:$0xff] }
  0x14   :  { %459 = vmatpush.xpose.msra.mxu3 %v3260_v13  ;;  %v4862_v17 = vand.u32 4294901760, %v3387_v4  ;;  %v3403_v18 = vsub.f32 %v125_v58, %v3379_v1  ;;  %v3418_v30 = vand.u32 4294901760, %v119_v22  ;;  %v116_v35 = vsel %vm96_vm0, %v46_v23, 0  ;;  %v73_v58 = vld [vmem:[%s4848_s0 + $0xe8] sm:$0xff]  ;;  %v72_v23 = vld [vmem:[%s4848_s0 + $0xe0] sm:$0xff] }
  0x15   :  { %394 = vmatpush.xpose.msra.mxu2 %v3293_v26  ;;  %v316_v8 = vand.u32 4294901760, %v315_v2  ;;  %v321_v12 = vsub.f32 %v3372_v62, %v4863_v3  ;;  %v3412_v24 = vsub.f32 %v122_v5, %v3395_v7  ;;  %v203_v41 = vsel %vm96_vm0, %v75_v32, 0 }
  0x16   :  { %v327_v28 = vsub.f32 %v3387_v4, %v4862_v17  ;;  %v4860_v31 = vand.u32 4294901760, %v3403_v18  ;;  %v3439_v48 = vand.u32 4294901760, %v116_v35  ;;  %v3442_v49 = vsub.f32 %v119_v22, %v3418_v30 }
  0x17   :  { %214 = vmatpush.xpose.msra.mxu0 %v3280_v21  ;;  %287 = vmatpush.xpose.msra.mxu1 %v286_v37  ;;  %v322_v27 = vand.u32 4294901760, %v321_v12  ;;  %v45_v37 = vld [vmem:[%s4848_s0 + $0x8] sm:$0xff]  ;;  %v4858_v38 = vand.u32 4294901760, %v3412_v24  ;;  %v3450_v55 = vand.u32 4294901760, %v203_v41  ;;  %v200_v56 = vsel %vm96_vm0, %v74_v42, 0 }
  0x18   :  { %461 = vmatpush.xpose.msra.mxu3 %v3280_v21  ;;  %v333_v45 = vsub.f32 %v3403_v18, %v4860_v31  ;;  %v3464_v2 = vsub.f32 %v116_v35, %v3439_v48  ;;  %v110_v5 = vsel %vm96_vm0, %v44_v52, 0  ;;  %v3468_v6 = vand.u32 4294901760, %v200_v56 }
  0x19   :  { %397 = vmatpush.xpose.msra.mxu2 %v3308_v34  ;;  %v339_v57 = vsub.f32 %v3412_v24, %v4858_v38  ;;  %v197_v12 = vsel %vm96_vm0, %v73_v58, 0  ;;  %v185_v14 = vsel %vm96_vm0, %v69_v61, 0  ;;  %vm1091_vm1 = vcmask 261120  }
  0x1a   :  { %v4856_v32 = vand.u32 4294901760, %v3464_v2  ;;  %v3593_v33 = vand.u32 4294901760, %v185_v14  ;;  %vm1611_vm9 = vcmask 1040384  }
  0x1b   :  { %216 = vmatpush.xpose.msra.mxu0 %v3299_v29  ;;  %293 = vmatpush.xpose.msra.mxu1 %v292_v44  ;;  %v328_v44 = vand.u32 4294901760, %v327_v28  ;;  %v340_v22 = vand.u32 4294901760, %v339_v57  ;;  %v3482_v28 = vand.u32 4294901760, %v110_v5  ;;  %v71_v57 = vld [vmem:[%s4848_s0 + $0xd8] sm:$0xff] }
  0x1c   :  { %463 = vmatpush.xpose.msra.mxu3 %v3299_v29 }
  0x1d   :  { %400 = vmatpush.xpose.msra.mxu2 %v3323_v40 }
  0x1f   :  { %218 = vmatpush.xpose.msra.mxu0 %v3315_v36  ;;  %299 = vmatpush.xpose.msra.mxu1 %v298_v51  ;;  %v113_v51 = vsel %vm96_vm0, %v45_v37, 0  ;;  %v3490_v37 = vsub.f32 %v200_v56, %v3468_v6  ;;  %v3503_v56 = vsub.f32 %v110_v5, %v3482_v28 }
  0x20   :  { %465 = vmatpush.xpose.msra.mxu3 %v3315_v36  ;;  %v3460_v63 = vand.u32 4294901760, %v113_v51 }
  0x21   :  { %403 = vmatpush.xpose.msra.mxu2 %v3332_v43  ;;  %v4865_v58 = vand.u32 4294901760, %v3490_v37  ;;  %v4866_v38 = vand.u32 4294901760, %v3503_v56 }
  0x22   :  { %v3486_v35 = vsub.f32 %v113_v51, %v3460_v63  ;;  %v351_v51 = vsub.f32 %v3464_v2, %v4856_v32 }
  0x23   :  { %220 = vmatpush.xpose.msra.mxu0 %v3338_v46  ;;  %305 = vmatpush.xpose.msra.mxu1 %v304_v59  ;;  %v334_v59 = vand.u32 4294901760, %v333_v45 }
  0x24   :  { %467 = vmatpush.xpose.msra.mxu3 %v3338_v46  ;;  %v4861_v52 = vand.u32 4294901760, %v3486_v35 }
  0x25   :  { %406 = vmatpush.xpose.msra.mxu2 %v3355_v54 }
  0x27   :  { %222 = vmatpush.xpose.msra.mxu0 %v3352_v53  ;;  %311 = vmatpush.xpose.msra.mxu1 %v310_v0  ;;  %v4857_v0 = vand.u32 4294901760, %v3442_v49 }
  0x28   :  { %469 = vmatpush.xpose.msra.mxu3 %v3352_v53 }
  0x29   :  { %409 = vmatpush.xpose.msra.mxu2 %v3372_v62 }
  0x2b   :  { %224 = vmatpush.xpose.msra.mxu0 %v3368_v60  ;;  %317 = vmatpush.xpose.msra.mxu1 %v316_v8  ;;  %v3472_v8 = vsub.f32 %v203_v41, %v3450_v55  ;;  %v3492_v41 = vand.u32 4294901760, %v197_v12 }
  0x2c   :  { %471 = vmatpush.xpose.msra.mxu3 %v3368_v60 }
  0x2d   :  { %412 = vmatpush.xpose.msra.mxu2 %v3387_v4  ;;  %v4859_v42 = vand.u32 4294901760, %v3472_v8 }
  0x2f   :  { %226 = vmatpush.xpose.msra.mxu0 %v3379_v1  ;;  %323 = vmatpush.xpose.msra.mxu1 %v322_v27  ;;  %v345_v27 = vsub.f32 %v3442_v49, %v4857_v0  ;;  %v707_v5 = vsub.f32 %v3472_v8, %v4859_v42  ;;  %v357_v0 = vsub.f32 %v3486_v35, %v4861_v52  ;;  %v70_v42 = vld [vmem:[%s4848_s0 + $0xd0] sm:$0xff] }
  0x30   :  { %473 = vmatpush.xpose.msra.mxu3 %v3379_v1  ;;  %v188_v3 = vsel %vm96_vm0, %v70_v42, 0 }
  0x31   :  { %415 = vmatpush.xpose.msra.mxu2 %v3403_v18  ;;  %v346_v45 = vand.u32 4294901760, %v345_v27  ;;  %v191_v27 = vsel %vm96_vm0, %v71_v57, 0  ;;  %v713_v57 = vsub.f32 %v3490_v37, %v4865_v58  ;;  %v358_v58 = vand.u32 4294901760, %v357_v0 }
  0x32   :  { %v3543_v52 = vand.u32 4294901760, %v191_v27 }
  0x33   :  { %228 = vmatpush.xpose.msra.mxu0 %v3395_v7  ;;  %329 = vmatpush.xpose.msra.mxu1 %v328_v44  ;;  %v194_v44 = vsel %vm96_vm0, %v72_v23, 0  ;;  %v29_v23 = vld [vmem:[%s4849_s1] sm:$0xff] }
  0x34   :  { %475 = vmatpush.xpose.msra.mxu3 %v3395_v7  ;;  %v98_v32 = vsel %vm96_vm0, %v29_v23, 0  ;;  %v708_v23 = vand.u32 4294901760, %v707_v5  ;;  %v3568_v0 = vsub.f32 %v191_v27, %v3543_v52 }
  0x35   :  { %418 = vmatpush.xpose.msra.mxu2 %v3412_v24  ;;  %v3532_v31 = vand.u32 4294901760, %v98_v32 }
  0x37   :  { %230 = vmatpush.xpose.msra.mxu0 %v3418_v30  ;;  %335 = vmatpush.xpose.msra.mxu1 %v334_v59  ;;  %v3511_v59 = vsub.f32 %v197_v12, %v3492_v41  ;;  %v352_v12 = vand.u32 4294901760, %v351_v51  ;;  %v3546_v17 = vsub.f32 %v98_v32, %v3532_v31  ;;  %v714_v32 = vand.u32 4294901760, %v713_v57  ;;  %v30_v57 = vld [vmem:[%s4849_s1 + $0x8] sm:$0xff] }
  0x38   :  { %477 = vmatpush.xpose.msra.mxu3 %v3418_v30  ;;  %v101_v27 = vsel %vm96_vm0, %v30_v57, 0 }
  0x39   :  { %421 = vmatpush.xpose.msra.mxu2 %v3442_v49  ;;  %4955 = vst [vmem:[#allocation6_spill] sm:$0xff] %v3546_v17  ;;  %v3557_v5 = vand.u32 4294901760, %v3546_v17  ;;  %v3585_v61 = vand.u32 4294901760, %v101_v27 }
  0x3b   :  { %232 = vmatpush.xpose.msra.mxu0 %v3439_v48  ;;  %341 = vmatpush.xpose.msra.mxu1 %v340_v22  ;;  %v3513_v22 = vand.u32 4294901760, %v194_v44  ;;  %4956 = vst [vmem:[#allocation7_spill] sm:$0xff] %v3557_v5  ;;  %v3603_v15 = vsub.f32 %v101_v27, %v3585_v61 }
  0x3c   :  { %479 = vmatpush.xpose.msra.mxu3 %v3439_v48 }
  0x3d   :  { %424 = vmatpush.xpose.msra.mxu2 %v3464_v2  ;;  %v3540_v51 = vsub.f32 %v194_v44, %v3513_v22  ;;  %v363_v44 = vsub.f32 %v3503_v56, %v4866_v38  ;;  %v3570_v38 = vand.u32 4294901760, %v188_v3  ;;  %4957 = vst [vmem:[#allocation8_spill] sm:$0xff] %v3603_v15 }
  0x3f   :  { %234 = vmatpush.xpose.msra.mxu0 %v3460_v63  ;;  %347 = vmatpush.xpose.msra.mxu1 %v346_v45  ;;  %v4867_v45 = vand.u32 4294901760, %v3511_v59 }
  0x40   :  { %481 = vmatpush.xpose.msra.mxu3 %v3460_v63 }
  0x41   :  { %427 = vmatpush.xpose.msra.mxu2 %v3486_v35  ;;  %v719_v42 = vsub.f32 %v3511_v59, %v4867_v45  ;;  %v364_v45 = vand.u32 4294901760, %v363_v44  ;;  %v3598_v44 = vsub.f32 %v188_v3, %v3570_v38 }
  0x43   :  { %236 = vmatpush.xpose.msra.mxu0 %v3482_v28  ;;  %353 = vmatpush.xpose.msra.mxu1 %v352_v12  ;;  %v4873_v12 = vand.u32 4294901760, %v3540_v51  ;;  %v720_v47 = vand.u32 4294901760, %v719_v42  ;;  %v3616_v42 = vsub.f32 %v185_v14, %v3593_v33 }
  0x44   :  { %483 = vmatpush.xpose.msra.mxu3 %v3482_v28 }
  0x45   :  { %430 = vmatpush.xpose.msra.mxu2 %v3503_v56  ;;  %v725_v39 = vsub.f32 %v3540_v51, %v4873_v12  ;;  %4959 = vst [vmem:[#allocation10_spill] sm:$0xff] %v3616_v42 }
  0x47   :  { %512 = vmatpush.xpose.msrb.mxu0 %v272_v19  ;;  %v240_v19 = vsub.f32 %v3546_v17, %v3557_v5  ;;  %359 = vmatpush.xpose.msra.mxu1 %v358_v58  ;;  %v4872_v58 = vand.u32 4294901760, %v3568_v0  ;;  %v726_v3 = vand.u32 4294901760, %v725_v39  ;;  %v66_v39 = vld [vmem:[%s4848_s0 + $0xb0] sm:$0xff] }
  0x48   :  { %709 = vmatpush.xpose.msrb.mxu3 %v708_v23  ;;  %v68_v23 = vld [vmem:[%s4848_s0 + $0xc0] sm:$0xff]  ;;  %433 = vmatmul.f32.vlgmr.msra.gmra.mxu2 %v3546_v17 }
  0x49   :  { %640 = vmatpush.xpose.msrb.mxu2 %v3450_v55  ;;  %v3583_v50 = vand.u32 4294901760, %v240_v19  ;;  %487 = vmatmul.f32.vlgmr.msra.gmra.mxu3 %v3557_v5  ;;  %v182_v19 = vsel %vm96_vm0, %v68_v23, 0  ;;  %v731_v23 = vsub.f32 %v3568_v0, %v4872_v58  ;;  %v4880_v58 = vand.u32 4294901760, %v3616_v42 }
  0x4a   :  { %v3618_v57 = vand.u32 4294901760, %v182_v19 }
  0x4b   :  { %516 = vmatpush.xpose.msrb.mxu0 %v278_v20  ;;  %v67_v20 = vld [vmem:[%s4848_s0 + $0xb8] sm:$0xff]  ;;  %365 = vmatpush.xpose.msra.mxu1 %v364_v45  ;;  %v732_v45 = vand.u32 4294901760, %v731_v23  ;;  %v4964_v23 = vand.u32 4294901760, %v3308_v34 }
  0x4c   :  { %715 = vmatpush.xpose.msrb.mxu3 %v714_v32  ;;  %242 = vmatmul.f32.vlgmr.msra.gmra.mxu0 %v3583_v50  ;;  %v3610_v32 = vand.u32 4294901760, %v3603_v15  ;;  %v179_v27 = vsel %vm96_vm0, %v67_v20, 0  ;;  %v4960_v20 = vand.u32 4294901760, %v3293_v26  ;;  %v3646_v12 = vsub.f32 %v182_v19, %v3618_v57  ;;  %v65_v19 = vld [vmem:[%s4848_s0 + $0xa8] sm:$0xff] }
  0x4d   :  { %642 = vmatpush.xpose.msrb.mxu2 %v3468_v6  ;;  %v173_v34 = vsel %vm96_vm0, %v65_v19, 0 }
  0x4e   :  { %4958 = vst [vmem:[#allocation9_spill] sm:$0xff] %v3610_v32  ;;  %v248_v16 = vsub.f32 %v3603_v15, %v3610_v32  ;;  %367 = vmatmul.f32.vlgmr.msra.gmra.mxu1 %v3532_v31 }
  0x4f   :  { %520 = vmatpush.xpose.msrb.mxu0 %v284_v25  ;;  %591 = vmatpush.xpose.msrb.mxu1 %v3253_v9  ;;  %v31_v9 = vld [vmem:[%s4849_s1 + $0x10] sm:$0xff] }
  0x50   :  { %721 = vmatpush.xpose.msrb.mxu3 %v720_v47  ;;  %v104_v25 = vsel %vm96_vm0, %v31_v9, 0  ;;  %v3636_v47 = vand.u32 4294901760, %v248_v16  ;;  %v3648_v9 = vand.u32 4294901760, %v179_v27  ;;  %v4961_v16 = vand.u32 4294901760, %v3598_v44  ;;  %438 = vmatmul.f32.gmra.mxu2 %v3603_v15 }
  0x51   :  { %644 = vmatpush.xpose.msrb.mxu2 %v3492_v41  ;;  %v3638_v14 = vand.u32 4294901760, %v104_v25  ;;  %493 = vmatmul.f32.gmra.mxu3 %v3610_v32 }
  0x52   :  { %v737_v5 = vsub.f32 %v3598_v44, %v4961_v16 }
  0x53   :  { %524 = vmatpush.xpose.msrb.mxu0 %v4960_v20  ;;  %593 = vmatpush.xpose.msrb.mxu1 %v3255_v10  ;;  %v3655_v26 = vsub.f32 %v104_v25, %v3638_v14  ;;  %v176_v10 = vsel %vm96_vm0, %v66_v39, 0  ;;  %v743_v25 = vsub.f32 %v3616_v42, %v4880_v58  ;;  %v4887_v39 = vand.u32 4294901760, %v3646_v12 }
  0x54   :  { %727 = vmatpush.xpose.msrb.mxu3 %v726_v3  ;;  %250 = vmatmul.f32.gmra.mxu0 %v3636_v47  ;;  %v3674_v20 = vsub.f32 %v179_v27, %v3648_v9  ;;  %v738_v16 = vand.u32 4294901760, %v737_v5  ;;  %v3676_v32 = vand.u32 4294901760, %v176_v10  ;;  %v4965_v58 = vand.u32 4294901760, %v3323_v40 }
  0x55   :  { %4962 = vst [vmem:[#allocation11_spill] sm:$0xff] %v3655_v26  ;;  %646 = vmatpush.xpose.msrb.mxu2 %v3513_v22  ;;  %v3663_v3 = vand.u32 4294901760, %v3655_v26  ;;  %v744_v19 = vand.u32 4294901760, %v743_v25  ;;  %v749_v17 = vsub.f32 %v3646_v12, %v4887_v39 }
  0x56   :  { %371 = vmatmul.f32.gmra.mxu1 %v3585_v61  ;;  %v4890_v42 = vand.u32 4294901760, %v3674_v20 }
  0x57   :  { %4963 = vst [vmem:[#allocation12_spill] sm:$0xff] %v3663_v3  ;;  %528 = vmatpush.xpose.msrb.mxu0 %v4964_v23  ;;  %595 = vmatpush.xpose.msrb.mxu1 %v3257_v11  ;;  %v256_v15 = vsub.f32 %v3655_v26, %v3663_v3  ;;  %v32_v11 = vld [vmem:[%s4849_s1 + $0x18] sm:$0xff] }
  0x58   :  { %733 = vmatpush.xpose.msrb.mxu3 %v732_v45  ;;  %v64_v45 = vld [vmem:[%s4848_s0 + $0xa0] sm:$0xff]  ;;  %v107_v5 = vsel %vm96_vm0, %v32_v11, 0  ;;  %v3705_v11 = vand.u32 4294901760, %v173_v34  ;;  %443 = vmatmul.f32.gmra.mxu2 %v3655_v26  ;;  %v755_v25 = vsub.f32 %v3674_v20, %v4890_v42 }
  0x59   :  { %648 = vmatpush.xpose.msrb.mxu2 %v3543_v52  ;;  %v3690_v27 = vand.u32 4294901760, %v256_v15  ;;  %v3692_v23 = vand.u32 4294901760, %v107_v5  ;;  %499 = vmatmul.f32.gmra.mxu3 %v3663_v3  ;;  %v3703_v15 = vsub.f32 %v176_v10, %v3676_v32  ;;  %v170_v3 = vsel %vm96_vm0, %v64_v45, 0 }
  0x5a   :  { %v4968_v10 = vand.u32 4294901760, %v3332_v43  ;;  %v750_v45 = vand.u32 4294901760, %v749_v17  ;;  %v3730_v39 = vsub.f32 %v173_v34, %v3705_v11  ;;  %v62_v43 = vld [vmem:[%s4848_s0 + $0x90] sm:$0xff]  ;;  %v4969_v17 = vand.u32 4294901760, %v3355_v54 }
  0x5b   :  { %532 = vmatpush.xpose.msrb.mxu0 %v4965_v58  ;;  %597 = vmatpush.xpose.msrb.mxu1 %v3260_v13  ;;  %v3710_v40 = vsub.f32 %v107_v5, %v3692_v23  ;;  %v63_v13 = vld [vmem:[%s4848_s0 + $0x98] sm:$0xff]  ;;  %v4891_v5 = vand.u32 4294901760, %v3703_v15  ;;  %v756_v34 = vand.u32 4294901760, %v755_v25  ;;  %v164_v54 = vsel %vm96_vm0, %v62_v43, 0  ;;  %v34_v43 = vld [vmem:[%s4850_s2 + $0x8] sm:$0xff] }
  0x5c   :  { %739 = vmatpush.xpose.msrb.mxu3 %v738_v16  ;;  %258 = vmatmul.f32.gmra.mxu0 %v3690_v27  ;;  %v3726_v16 = vand.u32 4294901760, %v170_v3  ;;  %v766_v42 = vand.u32 4294901760, %v3730_v39  ;;  %v4970_v25 = vand.u32 4294901760, %v3372_v62  ;;  %v60_v62 = vld [vmem:[%s4848_s0 + $0x80] sm:$0xff] }
  0x5d   :  { %4966 = vst [vmem:[#allocation13_spill] sm:$0xff] %v3710_v40  ;;  %650 = vmatpush.xpose.msrb.mxu2 %v3570_v38  ;;  %v3717_v58 = vand.u32 4294901760, %v3710_v40 }
  0x5e   :  { %375 = vmatmul.f32.gmra.mxu1 %v3638_v14 }
  0x5f   :  { %4967 = vst [vmem:[#allocation14_spill] sm:$0xff] %v3717_v58  ;;  %536 = vmatpush.xpose.msrb.mxu0 %v4968_v10  ;;  %599 = vmatpush.xpose.msrb.mxu1 %v3280_v21  ;;  %v264_v26 = vsub.f32 %v3710_v40, %v3717_v58  ;;  %v167_v21 = vsel %vm96_vm0, %v63_v13, 0  ;;  %v3747_v10 = vsub.f32 %v170_v3, %v3726_v16  ;;  %v61_v3 = vld [vmem:[%s4848_s0 + $0x88] sm:$0xff] }
  0x60   :  { %745 = vmatpush.xpose.msrb.mxu3 %v744_v19  ;;  %v761_v13 = vsub.f32 %v3703_v15, %v4891_v5  ;;  %448 = vmatmul.f32.gmra.mxu2 %v3710_v40  ;;  %v767_v5 = vsub.f32 %v3730_v39, %v766_v42  ;;  %v3775_v40 = vand.u32 4294901760, %v164_v54 }
  0x61   :  { %652 = vmatpush.xpose.msrb.mxu2 %v3593_v33  ;;  %v3740_v19 = vand.u32 4294901760, %v264_v26  ;;  %505 = vmatmul.f32.gmra.mxu3 %v3717_v58  ;;  %v3753_v26 = vand.u32 4294901760, %v167_v21 }
  0x63   :  { %540 = vmatpush.xpose.msrb.mxu0 %v4969_v17  ;;  %601 = vmatpush.xpose.msrb.mxu1 %v3299_v29  ;;  %v3190_v29 = vmov 0   ;;  %v762_v17 = vand.u32 4294901760, %v761_v13  ;;  %v3773_v58 = vsub.f32 %v167_v21, %v3753_v26  ;;  %v768_v13 = vand.u32 4294901760, %v767_v5 }
  0x64   :  { %751 = vmatpush.xpose.msrb.mxu3 %v750_v45  ;;  %266 = vmatmul.f32.gmra.mxu0 %v3740_v19  ;;  %v772_v45 = vand.u32 4294901760, %v3747_v10 }
  0x65   :  { %654 = vmatpush.xpose.msrb.mxu2 %v3618_v57  ;;  %3146 = vset.pattern.permute.xlu1 %v3190_v29 }
  0x66   :  { %3145 = vset.pattern.permute.xlu0 %v3190_v29  ;;  %83 = vperm.xlu1 %3146, %v34_v43   ;;  %v773_v21 = vsub.f32 %v3747_v10, %v772_v45 }
  0x67   :  { %544 = vmatpush.xpose.msrb.mxu0 %v4970_v25  ;;  %603 = vmatpush.xpose.msrb.mxu1 %v3315_v36  ;;  %v161_v36 = vsel %vm96_vm0, %v61_v3, 0  ;;  %v778_v3 = vand.u32 4294901760, %v3773_v58  ;;  %v3791_v25 = vsub.f32 %v164_v54, %v3775_v40 }
  0x68   :  { %757 = vmatpush.xpose.msrb.mxu3 %v756_v34  ;;  %379 = vmatmul.f32.gmra.mxu1 %v3692_v23  ;;  %v4971_v34 = vand.u32 4294901760, %v3387_v4  ;;  %v3793_v43 = vand.u32 4294901760, %v161_v36  ;;  %v158_v4 = vsel %vm96_vm0, %v60_v62, 0  ;;  %v774_v5 = vand.u32 4294901760, %v773_v21 }
  0x69   :  { %656 = vmatpush.xpose.msrb.mxu2 %v3648_v9  ;;  %3147 = vset.pattern.permute.xlu2 %v3190_v29  ;;  %v4972_v29 = vand.u32 4294901760, %v3403_v18  ;;  %v779_v54 = vsub.f32 %v3773_v58, %v778_v3  ;;  %v3810_v62 = vand.u32 4294901760, %v158_v4  ;;  %v4973_v18 = vand.u32 4294901760, %v3412_v24  ;;  %v36_v24 = vld [vmem:[%s4850_s2 + $0x18] sm:$0xff] }
  0x6a   :  { %93 = vperm.xlu0 %3145, %v36_v24  }
  0x6b   :  { %548 = vmatpush.xpose.msrb.mxu0 %v4971_v34  ;;  %605 = vmatpush.xpose.msrb.mxu1 %v3338_v46  ;;  %v33_v46 = vld [vmem:[%s4850_s2] sm:$0xff]  ;;  %v3808_v34 = vsub.f32 %v161_v36, %v3793_v43  ;;  %v3821_v36 = vsub.f32 %v158_v4, %v3810_v62 }
  0x6c   :  { %763 = vmatpush.xpose.msrb.mxu3 %v762_v17  ;;  %v784_v17 = vand.u32 4294901760, %v3791_v25 }
  0x6d   :  { %658 = vmatpush.xpose.msrb.mxu2 %v3676_v32  ;;  %v796_v4 = vand.u32 4294901760, %v3821_v36 }
  0x6e   :  { %78 = vperm.xlu1 %3146, %v33_v46   ;;  %v785_v21 = vsub.f32 %v3791_v25, %v784_v17  ;;  %v4974_v46 = vand.u32 4294901760, %v3442_v49 }
  0x6f   :  { %552 = vmatpush.xpose.msrb.mxu0 %v4972_v29  ;;  %607 = vmatpush.xpose.msrb.mxu1 %v3352_v53  ;;  %v780_v53 = vand.u32 4294901760, %v779_v54  ;;  %v35_v54 = vld [vmem:[%s4850_s2 + $0x10] sm:$0xff] }
  0x70   :  { %769 = vmatpush.xpose.msrb.mxu3 %v768_v13  ;;  %v790_v13 = vand.u32 4294901760, %v3808_v34 }
  0x71   :  { %660 = vmatpush.xpose.msrb.mxu2 %v3705_v11 }
  0x72   :  { %v791_v29 = vsub.f32 %v3808_v34, %v790_v13  ;;  %88 = vperm.xlu0 %3145, %v35_v54  }
  0x73   :  { %556 = vmatpush.xpose.msrb.mxu0 %v4973_v18  ;;  %609 = vmatpush.xpose.msrb.mxu1 %v3368_v60  ;;  %v786_v60 = vand.u32 4294901760, %v785_v21  ;;  %v4976_v18 = vand.u32 4294901760, %v3486_v35  ;;  %v4978_v35 = vand.u32 4294901760, %v3472_v8 }
  0x74   :  { %775 = vmatpush.xpose.msrb.mxu3 %v774_v5  ;;  %v4975_v5 = vand.u32 4294901760, %v3464_v2  ;;  %v792_v49 = vand.u32 4294901760, %v791_v29 }
  0x75   :  { %662 = vmatpush.xpose.msrb.mxu2 %v3726_v16 }
  0x77   :  { %560 = vmatpush.xpose.msrb.mxu0 %v4974_v46  ;;  %611 = vmatpush.xpose.msrb.mxu1 %v3379_v1  ;;  %v797_v1 = vsub.f32 %v3821_v36, %v796_v4 }
  0x78   :  { %781 = vmatpush.xpose.msrb.mxu3 %v780_v53 }
  0x79   :  { %664 = vmatpush.xpose.msrb.mxu2 %v3753_v26  ;;  %v798_v2 = vand.u32 4294901760, %v797_v1 }
  0x7b   :  { %564 = vmatpush.xpose.msrb.mxu0 %v4975_v5  ;;  %613 = vmatpush.xpose.msrb.mxu1 %v3395_v7  ;;  %v4977_v7 = vand.u32 4294901760, %v3503_v56  ;;  %v4989_v56 = vld [vmem:[#allocation6_spill] sm:$0xff] }
  0x7c   :  { %787 = vmatpush.xpose.msrb.mxu3 %v786_v60 }
  0x7d   :  { %666 = vmatpush.xpose.msrb.mxu2 %v3775_v40 }
  0x7f   :  { %568 = vmatpush.xpose.msrb.mxu0 %v4976_v18  ;;  %615 = vmatpush.xpose.msrb.mxu1 %v3418_v30  ;;  %v4979_v30 = vand.u32 4294901760, %v3490_v37 }
  0x80   :  { %793 = vmatpush.xpose.msrb.mxu3 %v792_v49 }
  0x81   :  { %668 = vmatpush.xpose.msrb.mxu2 %v3793_v43 }
  0x83   :  { %572 = vmatpush.xpose.msrb.mxu0 %v4977_v7  ;;  %617 = vmatpush.xpose.msrb.mxu1 %v3439_v48  ;;  %v4980_v48 = vand.u32 4294901760, %v3511_v59 }
  0x84   :  { %799 = vmatpush.xpose.msrb.mxu3 %v798_v2 }
  0x85   :  { %670 = vmatpush.xpose.msrb.mxu2 %v3810_v62 }
  0x86   :  { %574 = vmatmul.f32.vlgmr.msrb.gmra.mxu0 %v3532_v31 }
  0x87   :  { %819 = vmatpush.xpose.msra.mxu0 %v3472_v8  ;;  %619 = vmatpush.xpose.msrb.mxu1 %v3460_v63  ;;  %v4982_v63 = vand.u32 4294901760, %v3568_v0  ;;  %v4984_v8 = vld [vmem:[#allocation10_spill] sm:$0xff] }
  0x88   :  { %1025 = vmatpush.xpose.msra.mxu3 %v3450_v55  ;;  %676 = vmatmul.f32.vlgmr.msrb.gmra.mxu2 %v3583_v50 }
  0x89   :  { %946 = vmatpush.xpose.msra.mxu2 %v4978_v35  ;;  %801 = vmatmul.f32.vlgmr.msrb.gmra.mxu3 %v3532_v31 }
  0x8b   :  { %822 = vmatpush.xpose.msra.mxu0 %v3490_v37  ;;  %621 = vmatpush.xpose.msrb.mxu1 %v3482_v28  ;;  %v4985_v28 = vand.u32 4294901760, %v4984_v8  ;;  %v4986_v37 = vand.u32 4294901760, %v3646_v12 }
  0x8c   :  { %1027 = vmatpush.xpose.msra.mxu3 %v3468_v6 }
  0x8d   :  { %950 = vmatpush.xpose.msra.mxu2 %v4979_v30 }
  0x8e   :  { %623 = vmatmul.f32.vlgmr.msrb.gmra.mxu1 %v3532_v31  ;;  %578 = vmatmul.f32.gmra.mxu0 %v3585_v61 }
  0x8f   :  { %825 = vmatpush.xpose.msra.mxu0 %v3511_v59  ;;  %887 = vmatpush.xpose.msra.mxu1 %v3450_v55  ;;  %v4981_v55 = vand.u32 4294901760, %v3540_v51  ;;  %v4990_v59 = vld [vmem:[#allocation8_spill] sm:$0xff] }
  0x90   :  { %1029 = vmatpush.xpose.msra.mxu3 %v3492_v41  ;;  %684 = vmatmul.f32.gmra.mxu2 %v3636_v47 }
  0x91   :  { %954 = vmatpush.xpose.msra.mxu2 %v4980_v48  ;;  %805 = vmatmul.f32.gmra.mxu3 %v3585_v61 }
  0x93   :  { %828 = vmatpush.xpose.msra.mxu0 %v3540_v51  ;;  %889 = vmatpush.xpose.msra.mxu1 %v3468_v6  ;;  %v4983_v6 = vand.u32 4294901760, %v3598_v44  ;;  %v4992_v51 = vld [vmem:[#allocation11_spill] sm:$0xff] }
  0x94   :  { %1031 = vmatpush.xpose.msra.mxu3 %v3513_v22 }
  0x95   :  { %958 = vmatpush.xpose.msra.mxu2 %v4981_v55 }
  0x96   :  { %627 = vmatmul.f32.gmra.mxu1 %v3585_v61  ;;  %582 = vmatmul.f32.gmra.mxu0 %v3638_v14 }
  0x97   :  { %831 = vmatpush.xpose.msra.mxu0 %v3568_v0  ;;  %891 = vmatpush.xpose.msra.mxu1 %v3492_v41  ;;  %v4987_v41 = vand.u32 4294901760, %v3674_v20  ;;  %v4994_v0 = vld [vmem:[#allocation13_spill] sm:$0xff] }
  0x98   :  { %1033 = vmatpush.xpose.msra.mxu3 %v3543_v52  ;;  %692 = vmatmul.f32.gmra.mxu2 %v3690_v27 }
  0x99   :  { %962 = vmatpush.xpose.msra.mxu2 %v4982_v63  ;;  %809 = vmatmul.f32.gmra.mxu3 %v3638_v14 }
  0x9b   :  { %834 = vmatpush.xpose.msra.mxu0 %v3598_v44  ;;  %893 = vmatpush.xpose.msra.mxu1 %v3513_v22  ;;  %v4991_v22 = vld [vmem:[#allocation7_spill] sm:$0xff]  ;;  %v4995_v44 = vld [vmem:[#allocation12_spill] sm:$0xff] }
  0x9c   :  { %1035 = vmatpush.xpose.msra.mxu3 %v3570_v38 }
  0x9d   :  { %966 = vmatpush.xpose.msra.mxu2 %v4983_v6 }
  0x9e   :  { %631 = vmatmul.f32.gmra.mxu1 %v3638_v14  ;;  %586 = vmatmul.f32.gmra.mxu0 %v3692_v23 }
  0x9f   :  { %837 = vmatpush.xpose.msra.mxu0 %v4984_v8  ;;  %895 = vmatpush.xpose.msra.mxu1 %v3543_v52  ;;  %v42_v52 = vld [vmem:[%s4853_s5 + $0x8] sm:$0xff] }
  0xa0   :  { %1037 = vmatpush.xpose.msra.mxu3 %v3593_v33  ;;  %700 = vmatmul.f32.gmra.mxu2 %v3740_v19 }
  0xa1   :  { %970 = vmatpush.xpose.msra.mxu2 %v4985_v28  ;;  %813 = vmatmul.f32.gmra.mxu3 %v3692_v23 }
  0xa2   :  { %1541 = vperm.xlu1 %3146, %v42_v52  }
  0xa3   :  { %840 = vmatpush.xpose.msra.mxu0 %v3646_v12  ;;  %897 = vmatpush.xpose.msra.mxu1 %v3570_v38  ;;  %v4988_v38 = vand.u32 4294901760, %v3703_v15  ;;  %v4993_v12 = vld [vmem:[#allocation9_spill] sm:$0xff] }
  0xa4   :  { %1039 = vmatpush.xpose.msra.mxu3 %v3618_v57 }
  0xa5   :  { %974 = vmatpush.xpose.msra.mxu2 %v4986_v37  ;;  %v37_v37 = vld [vmem:[%s4851_s3] sm:$0xff] }
  0xa6   :  { %635 = vmatmul.f32.gmra.mxu1 %v3692_v23 }
  0xa7   :  { %843 = vmatpush.xpose.msra.mxu0 %v3674_v20  ;;  %899 = vmatpush.xpose.msra.mxu1 %v3593_v33  ;;  %v41_v33 = vld [vmem:[%s4853_s5] sm:$0xff] }
  0xa8   :  { %1041 = vmatpush.xpose.msra.mxu3 %v3648_v9  ;;  %1536 = vperm.xlu0 %3145, %v41_v33  }
  0xa9   :  { %978 = vmatpush.xpose.msra.mxu2 %v4987_v41 }
  0xab   :  { %846 = vmatpush.xpose.msra.mxu0 %v3703_v15  ;;  %901 = vmatpush.xpose.msra.mxu1 %v3618_v57 }
  0xac   :  { %1043 = vmatpush.xpose.msra.mxu3 %v3676_v32 }
  0xad   :  { %982 = vmatpush.xpose.msra.mxu2 %v4988_v38 }
  0xaf   :  { %849 = vmatpush.xpose.msra.mxu0 %v3730_v39  ;;  %903 = vmatpush.xpose.msra.mxu1 %v3648_v9 }
  0xb0   :  { %1045 = vmatpush.xpose.msra.mxu3 %v3705_v11 }
  0xb1   :  { %986 = vmatpush.xpose.msra.mxu2 %v766_v42  ;;  %v4996_v42 = vld [vmem:[#allocation14_spill] sm:$0xff] }
  0xb3   :  { %852 = vmatpush.xpose.msra.mxu0 %v3747_v10  ;;  %905 = vmatpush.xpose.msra.mxu1 %v3676_v32 }
  0xb4   :  { %1047 = vmatpush.xpose.msra.mxu3 %v3726_v16 }
  0xb5   :  { %990 = vmatpush.xpose.msra.mxu2 %v772_v45 }
  0xb7   :  { %855 = vmatpush.xpose.msra.mxu0 %v3773_v58  ;;  %907 = vmatpush.xpose.msra.mxu1 %v3705_v11 }
  0xb8   :  { %1049 = vmatpush.xpose.msra.mxu3 %v3753_v26 }
  0xb9   :  { %994 = vmatpush.xpose.msra.mxu2 %v778_v3 }
  0xbb   :  { %858 = vmatpush.xpose.msra.mxu0 %v3791_v25  ;;  %909 = vmatpush.xpose.msra.mxu1 %v3726_v16 }
  0xbc   :  { %1051 = vmatpush.xpose.msra.mxu3 %v3775_v40 }
  0xbd   :  { %998 = vmatpush.xpose.msra.mxu2 %v784_v17 }
  0xbf   :  { %861 = vmatpush.xpose.msra.mxu0 %v3808_v34  ;;  %911 = vmatpush.xpose.msra.mxu1 %v3753_v26 }
  0xc0   :  { %1053 = vmatpush.xpose.msra.mxu3 %v3793_v43 }
  0xc1   :  { %1002 = vmatpush.xpose.msra.mxu2 %v790_v13 }
  0xc3   :  { %864 = vmatpush.xpose.msra.mxu0 %v3821_v36  ;;  %913 = vmatpush.xpose.msra.mxu1 %v3775_v40 }
  0xc4   :  { %1055 = vmatpush.xpose.msra.mxu3 %v3810_v62 }
  0xc5   :  { %1006 = vmatpush.xpose.msra.mxu2 %v796_v4 }
  0xc6   :  { %867 = vmatmul.f32.vlgmr.msra.gmra.mxu0 %v4989_v56 }
  0xc7   :  { %915 = vmatpush.xpose.msra.mxu1 %v3793_v43  ;;  %1057 = vmatmul.f32.vlgmr.msra.gmra.mxu3 %v3532_v31 }
  0xc8   :  { %1008 = vmatmul.f32.vlgmr.msra.gmra.mxu2 %v3532_v31 }
  0xc9   :  { %v243_v32 = vpop.f32.mrf.mxu0 }
  0xcb   :  { %917 = vmatpush.xpose.msra.mxu1 %v3810_v62  ;;  %v368_v57 = vpop.f32.mrf.mxu1  ;;  %v434_v11 = vpop.f32.mrf.mxu2 }
  0xcc   :  { %v488_v58 = vpop.f32.mrf.mxu3 }
  0xce   :  { %872 = vmatmul.f32.gmra.mxu0 %v4990_v59  ;;  %921 = vmatmul.f32.vlgmr.msra.gmra.mxu1 %v4991_v22 }
  0xcf   :  { %1061 = vmatmul.f32.gmra.mxu3 %v3585_v61 }
  0xd0   :  { %1012 = vmatmul.f32.gmra.mxu2 %v3585_v61 }
  0xd1   :  { %v251_v9 = vpop.f32.mrf.mxu0 }
  0xd3   :  { %v372_v39 = vpop.f32.mrf.mxu1  ;;  %v439_v45 = vpop.f32.mrf.mxu2 }
  0xd4   :  { %v494_v25 = vpop.f32.mrf.mxu3 }
  0xd6   :  { %877 = vmatmul.f32.gmra.mxu0 %v4992_v51  ;;  %927 = vmatmul.f32.gmra.mxu1 %v4993_v12 }
  0xd7   :  { %1065 = vmatmul.f32.gmra.mxu3 %v3638_v14 }
  0xd8   :  { %1016 = vmatmul.f32.gmra.mxu2 %v3638_v14  ;;  %v3975_v10 = vpop.permute.xlu1 %83 }
  0xd9   :  { %v259_v20 = vpop.f32.mrf.mxu0  ;;  %4998 = vst [vmem:[#allocation15_spill] sm:$0xff] %v3975_v10  ;;  %v252_v34 = vadd.f32 %v251_v9, %v3975_v10 }
  0xdb   :  { %v376_v15 = vpop.f32.mrf.mxu1  ;;  %v444_v13 = vpop.f32.mrf.mxu2  ;;  %v373_v36 = vadd.f32 %v372_v39, %v252_v34 }
  0xdc   :  { %v3973_v16 = vpop.permute.xlu0 %93  ;;  %v500_v60 = vpop.f32.mrf.mxu3 }
  0xdd   :  { %4997 = vst [vmem:[#allocation10_spill] sm:$0xff] %v3973_v16  ;;  %v440_v4 = vadd.f32 %v439_v45, %v373_v36 }
  0xde   :  { %882 = vmatmul.f32.gmra.mxu0 %v4994_v0  ;;  %933 = vmatmul.f32.gmra.mxu1 %v4995_v44 }
  0xdf   :  { %1069 = vmatmul.f32.gmra.mxu3 %v3692_v23  ;;  %v495_v18 = vadd.f32 %v494_v25, %v440_v4 }
  0xe0   :  { %1020 = vmatmul.f32.gmra.mxu2 %v3692_v23  ;;  %v3979_v17 = vpop.permute.xlu1 %78 }
  0xe1   :  { %v267_v40 = vpop.f32.mrf.mxu0  ;;  %5000 = vst [vmem:[#allocation17_spill] sm:$0xff] %v3979_v17  ;;  %v244_v53 = vadd.f32 %v243_v32, %v3979_v17 }
  0xe2   :  { %v268_v49 = vadd.f32 %v267_v40, %v3973_v16 }
  0xe3   :  { %v369_v29 = vadd.f32 %v368_v57, %v244_v53  ;;  %v449_v30 = vpop.f32.mrf.mxu2  ;;  %v1093_v57 = vsel %vm1091_vm1, %v37_v37, 0 }
  0xe4   :  { %v3977_v43 = vpop.permute.xlu0 %88  ;;  %v506_v55 = vpop.f32.mrf.mxu3  ;;  %v3991_v40 = vand.u32 4294901760, %v1093_v57 }
  0xe5   :  { %v380_v26 = vpop.f32.mrf.mxu1  ;;  %4999 = vst [vmem:[#allocation16_spill] sm:$0xff] %v3977_v43  ;;  %v260_v62 = vadd.f32 %v259_v20, %v3977_v43  ;;  %v435_v1 = vadd.f32 %v434_v11, %v369_v29 }
  0xe6   :  { %939 = vmatmul.f32.gmra.mxu1 %v4996_v42  ;;  %v381_v35 = vadd.f32 %v380_v26, %v268_v49  ;;  %5001 = vst [vmem:[#allocation18_spill] sm:$0xff] %v3991_v40  ;;  %v4003_v53 = vsub.f32 %v1093_v57, %v3991_v40 }
  0xe7   :  { %v377_v46 = vadd.f32 %v376_v15, %v260_v62  ;;  %v489_v48 = vadd.f32 %v488_v58, %v435_v1 }
  0xe8   :  { %v450_v8 = vadd.f32 %v449_v30, %v381_v35  ;;  %5002 = vst [vmem:[#allocation19_spill] sm:$0xff] %v4003_v53  ;;  %v4009_v29 = vand.u32 4294901760, %v4003_v53 }
  0xe9   :  { %v445_v5 = vadd.f32 %v444_v13, %v377_v46 }
  0xea   :  { %v507_v52 = vadd.f32 %v506_v55, %v450_v8  ;;  %5003 = vst [vmem:[#allocation20_spill] sm:$0xff] %v4009_v29  ;;  %v1121_v35 = vsub.f32 %v4003_v53, %v4009_v29 }
  0xeb   :  { %v501_v2 = vadd.f32 %v500_v60, %v445_v5 }
 0x103   :  { %v575_v3 = vpop.f32.mrf.mxu0 }
 0x104   :  { %v576_v28 = vadd.f32 %v575_v3, %v489_v48  ;;  %v38_v3 = vld [vmem:[%s4851_s3 + $0x8] sm:$0xff] }
 0x10b   :  { %v624_v21 = vpop.f32.mrf.mxu1  ;;  %v579_v24 = vpop.f32.mrf.mxu0 }
 0x10c   :  { %v580_v63 = vadd.f32 %v579_v24, %v495_v18  ;;  %v625_v9 = vadd.f32 %v624_v21, %v576_v28  ;;  %v3989_v20 = vpop.f32.mrf.mxu3  ;;  %v3993_v58 = vpop.f32.mrf.mxu2  ;;  %v1096_v21 = vsel %vm1091_vm1, %v38_v3, 0  ;;  %v4026_v28 = vand.u32 4294901760, %v1121_v35  ;;  %v39_v3 = vld [vmem:[%s4852_s4] sm:$0xff] }
 0x10d   :  { %v4011_v4 = vand.u32 4294901760, %v1096_v21  ;;  %1083 = vperm.xlu2 %3147, %v39_v3  }
 0x10e   :  { %v1073_v26 = vmax.f32 %v625_v9, 0.0  ;;  %5006 = vst [vmem:[#allocation23_spill] sm:$0xff] %v4026_v28 }
 0x10f   :  { %5004 = vst [vmem:[#allocation21_spill] sm:$0xff] %v4011_v4  ;;  %v4021_v30 = vsub.f32 %v1096_v21, %v4011_v4 }
 0x110   :  { %v1116_v13 = vand.u32 4294901760, %v1073_v26 }
 0x111   :  { %5005 = vst [vmem:[#allocation22_spill] sm:$0xff] %v4021_v30  ;;  %v4029_v37 = vand.u32 4294901760, %v4021_v30 }
 0x112   :  { %v1166_v1 = vsub.f32 %v1073_v26, %v1116_v13 }
 0x113   :  { %v628_v54 = vpop.f32.mrf.mxu1  ;;  %v583_v7 = vpop.f32.mrf.mxu0  ;;  %5007 = vst [vmem:[#allocation24_spill] sm:$0xff] %v4029_v37 }
 0x114   :  { %v584_v6 = vadd.f32 %v583_v7, %v501_v2  ;;  %v629_v38 = vadd.f32 %v628_v54, %v580_v63  ;;  %v4013_v5 = vpop.f32.mrf.mxu3  ;;  %v4015_v18 = vpop.f32.mrf.mxu2  ;;  %v1167_v63 = vand.u32 4294901760, %v1166_v1 }
 0x116   :  { %v1075_v15 = vmax.f32 %v629_v38, 0.0  ;;  %v1168_v38 = vsub.f32 %v1166_v1, %v1167_v63 }
 0x118   :  { %v4000_v34 = vand.u32 4294901760, %v1075_v15  ;;  %v1169_v9 = vand.u32 4294901760, %v1168_v38 }
 0x11a   :  { %v1160_v60 = vsub.f32 %v1075_v15, %v4000_v34 }
 0x11b   :  { %v632_v41 = vpop.f32.mrf.mxu1  ;;  %v587_v32 = vpop.f32.mrf.mxu0 }
 0x11c   :  { %v633_v33 = vadd.f32 %v632_v41, %v584_v6  ;;  %v588_v11 = vadd.f32 %v587_v32, %v507_v52  ;;  %v1161_v7 = vand.u32 4294901760, %v1160_v60  ;;  %v1129_v32 = vsub.f32 %v4021_v30, %v4029_v37  ;;  %v693_v57 = vpop.f32.mrf.mxu2 }
 0x11e   :  { %v1077_v39 = vmax.f32 %v633_v33, 0.0  ;;  %v1162_v8 = vsub.f32 %v1160_v60, %v1161_v7  ;;  %v810_v33 = vpop.f32.mrf.mxu3 }
 0x120   :  { %v3995_v45 = vand.u32 4294901760, %v1077_v39  ;;  %v1163_v52 = vand.u32 4294901760, %v1162_v8 }
 0x122   :  { %v1154_v24 = vsub.f32 %v1077_v39, %v3995_v45  ;;  %v4036_v39 = vand.u32 4294901760, %v1129_v32 }
 0x123   :  { %v636_v25 = vpop.f32.mrf.mxu1 }
 0x124   :  { %v637_v62 = vadd.f32 %v636_v25, %v588_v11  ;;  %v1155_v54 = vand.u32 4294901760, %v1154_v24  ;;  %5008 = vst [vmem:[#allocation25_spill] sm:$0xff] %v4036_v39  ;;  %v701_v11 = vpop.f32.mrf.mxu2 }
 0x125   :  { %v702_v8 = vadd.f32 %v701_v11, %v3973_v16  ;;  %v1633_v11 = vld [vmem:[%s4848_s0 + $0x170] sm:$0xff] }
 0x126   :  { %v1079_v36 = vmax.f32 %v637_v62, 0.0  ;;  %v1156_v55 = vsub.f32 %v1154_v24, %v1155_v54  ;;  %v814_v15 = vpop.f32.mrf.mxu3 }
 0x128   :  { %v1110_v46 = vand.u32 4294901760, %v1079_v36  ;;  %v1157_v41 = vand.u32 4294901760, %v1156_v55 }
 0x12a   :  { %v1148_v49 = vsub.f32 %v1079_v36, %v1110_v46  ;;  %1111 = vmatpush.msrb.mxu0 %v1110_v46  ;;  %1228 = vmatpush.msrb.mxu3 %v1110_v46  ;;  %v678_v36 = vadd.f32 %v3993_v58, %v3979_v17 }
 0x12c   :  { %1113 = vmatpush.msrb.mxu0 %v3995_v45  ;;  %1194 = vmatpush.msrb.mxu2 %v1148_v49  ;;  %v1149_v2 = vand.u32 4294901760, %v1148_v49 }
 0x12d   :  { %1230 = vmatpush.msrb.mxu3 %v3995_v45 }
 0x12e   :  { %1115 = vmatpush.msrb.mxu0 %v4000_v34  ;;  %1197 = vmatpush.msrb.mxu2 %v1154_v24  ;;  %v1150_v48 = vsub.f32 %v1148_v49, %v1149_v2  ;;  %v694_v49 = vadd.f32 %v693_v57, %v3977_v43 }
 0x12f   :  { %1232 = vmatpush.msrb.mxu3 %v4000_v34 }
 0x130   :  { %1117 = vmatpush.msrb.mxu0 %v1116_v13  ;;  %1200 = vmatpush.msrb.mxu2 %v1160_v60  ;;  %v1151_v6 = vand.u32 4294901760, %v1150_v48  ;;  %v811_v35 = vadd.f32 %v810_v33, %v694_v49 }
 0x131   :  { %1234 = vmatpush.msrb.mxu3 %v1116_v13  ;;  %1123 = vmatmul.f32.vlgmr.msrb.gmra.mxu0 %v4026_v28 }
 0x132   :  { %1263 = vmatpush.msra.mxu0 %v1149_v2  ;;  %1152 = vmatpush.msrb.mxu1 %v1151_v6  ;;  %v803_v2 = vadd.f32 %v3989_v20, %v678_v36 }
 0x133   :  { %1203 = vmatpush.msrb.mxu2 %v1166_v1  ;;  %1238 = vmatmul.f32.vlgmr.msrb.gmra.mxu3 %v4009_v29 }
 0x134   :  { %1267 = vmatpush.msra.mxu0 %v1155_v54  ;;  %1206 = vmatmul.f32.vlgmr.msrb.gmra.mxu2 %v4003_v53 }
 0x135   :  { %1158 = vmatpush.msrb.mxu1 %v1157_v41 }
 0x136   :  { %1271 = vmatpush.msra.mxu0 %v1161_v7 }
 0x137   :  { %1164 = vmatpush.msrb.mxu1 %v1163_v52  ;;  %v1634_v52 = vld [vmem:[%s4848_s0 + $0x178] sm:$0xff] }
 0x138   :  { %1275 = vmatpush.msra.mxu0 %v1167_v63  ;;  %v1697_v3 = vsel %vm96_vm0, %v1634_v52, 0 }
 0x139   :  { %1170 = vmatpush.msrb.mxu1 %v1169_v9  ;;  %1131 = vmatmul.f32.gmra.mxu0 %v4036_v39  ;;  %v815_v9 = vadd.f32 %v814_v15, %v702_v8  ;;  %v4070_v36 = vand.u32 4294901760, %v1697_v3  ;;  %v1694_v15 = vsel %vm96_vm0, %v1633_v11, 0 }
 0x13a   :  { %1172 = vmatmul.f32.vlgmr.msrb.gmra.mxu1 %v3991_v40 }
 0x13b   :  { %1298 = vmatpush.msra.mxu1 %v1110_v46  ;;  %1244 = vmatmul.f32.gmra.mxu3 %v4029_v37 }
 0x13c   :  { %1211 = vmatmul.f32.gmra.mxu2 %v4021_v30 }
 0x13d   :  { %1300 = vmatpush.msra.mxu1 %v3995_v45 }
 0x13f   :  { %1302 = vmatpush.msra.mxu1 %v4000_v34  ;;  %v40_v34 = vld [vmem:[%s4852_s4 + $0x8] sm:$0xff] }
 0x140   :  { %1088 = vperm.xlu2 %3147, %v40_v34  }
 0x141   :  { %1304 = vmatpush.msra.mxu1 %v1116_v13  ;;  %1277 = vmatmul.f32.vlgmr.msra.gmra.mxu0 %v3991_v40  ;;  %v686_v13 = vadd.f32 %v4015_v18, %v3975_v10 }
 0x142   :  { %1176 = vmatmul.f32.gmra.mxu1 %v4011_v4 }
 0x143   :  { %v868_v26 = vpop.f32.mrf.mxu0  ;;  %v807_v60 = vadd.f32 %v4013_v5, %v686_v13 }
 0x144   :  { %v869_v48 = vadd.f32 %v868_v26, %v803_v2  ;;  %v4079_v2 = vsub.f32 %v1697_v3, %v4070_v36  ;;  %v1630_v3 = vld [vmem:[%s4848_s0 + $0x158] sm:$0xff] }
 0x146   :  { %v4905_v8 = vand.u32 4294901760, %v4079_v2 }
 0x149   :  { %1281 = vmatmul.f32.gmra.mxu0 %v4011_v4 }
 0x14a   :  { %v1058_v45 = vpop.f32.mrf.mxu3  ;;  %1306 = vmatmul.f32.vlgmr.msra.gmra.mxu1 %v3991_v40 }
 0x14b   :  { %v873_v25 = vpop.f32.mrf.mxu0  ;;  %v922_v62 = vpop.f32.mrf.mxu1 }
 0x14c   :  { %v1009_v21 = vpop.f32.mrf.mxu2  ;;  %v874_v7 = vadd.f32 %v873_v25, %v807_v60  ;;  %v923_v18 = vadd.f32 %v922_v62, %v869_v48  ;;  %v4083_v48 = vand.u32 4294901760, %v1694_v15 }
 0x14e   :  { %v1010_v32 = vadd.f32 %v1009_v21, %v923_v18  ;;  %v43_v18 = vld [vmem:[#allocation2] sm:$0x1]  ;;  %v4097_v52 = vsub.f32 %v1694_v15, %v4083_v48 }
 0x14f   :  { %1564 = vperm.xlu2 %3147, %v43_v18  }
 0x150   :  { %v1059_v25 = vadd.f32 %v1058_v45, %v1010_v32  ;;  %v1632_v45 = vld [vmem:[%s4848_s0 + $0x168] sm:$0xff] }
 0x152   :  { %v1062_v24 = vpop.f32.mrf.mxu3  ;;  %1310 = vmatmul.f32.gmra.mxu1 %v4011_v4 }
 0x153   :  { %v928_v46 = vpop.f32.mrf.mxu1  ;;  %v878_v54 = vpop.f32.mrf.mxu0 }
 0x154   :  { %v1013_v1 = vpop.f32.mrf.mxu2  ;;  %v929_v55 = vadd.f32 %v928_v46, %v874_v7  ;;  %v879_v63 = vadd.f32 %v878_v54, %v811_v35 }
 0x156   :  { %v1014_v41 = vadd.f32 %v1013_v1, %v929_v55  ;;  %v1691_v55 = vsel %vm96_vm0, %v1632_v45, 0 }
 0x157   :  { %v4099_v32 = vand.u32 4294901760, %v1691_v55 }
 0x158   :  { %v1063_v33 = vadd.f32 %v1062_v24, %v1014_v41  ;;  %v1074_v24 = vmax.f32 %v1059_v25, 0.0  ;;  %v1631_v41 = vld [vmem:[%s4848_s0 + $0x160] sm:$0xff] }
 0x159   :  { %v4115_v11 = vsub.f32 %v1691_v55, %v4099_v32 }
 0x15a   :  { %v1066_v58 = vpop.f32.mrf.mxu3  ;;  %v1076_v46 = vmax.f32 %v1063_v33, 0.0  ;;  %v1688_v33 = vsel %vm96_vm0, %v1631_v41, 0 }
 0x15b   :  { %v934_v6 = vpop.f32.mrf.mxu1  ;;  %v883_v20 = vpop.f32.mrf.mxu0  ;;  %v4902_v55 = vand.u32 4294901760, %v4115_v11 }
 0x15c   :  { %v935_v5 = vadd.f32 %v934_v6, %v879_v63  ;;  %v1017_v38 = vpop.f32.mrf.mxu2  ;;  %v884_v62 = vadd.f32 %v883_v20, %v815_v9  ;;  %v4081_v7 = vand.u32 4294901760, %v1076_v46  ;;  %v4086_v63 = vand.u32 4294901760, %v1074_v24 }
 0x15e   :  { %v1018_v57 = vadd.f32 %v1017_v38, %v935_v5  ;;  %v1376_v38 = vsub.f32 %v1076_v46, %v4081_v7  ;;  %v1382_v20 = vsub.f32 %v1074_v24, %v4086_v63  ;;  %v1629_v24 = vld [vmem:[%s4848_s0 + $0x150] sm:$0xff] }
 0x160   :  { %v1067_v26 = vadd.f32 %v1066_v58, %v1018_v57 }
 0x162   :  { %v1078_v34 = vmax.f32 %v1067_v26, 0.0  ;;  %v1070_v49 = vpop.f32.mrf.mxu3  ;;  %v1815_v26 = vsub.f32 %v4079_v2, %v4905_v8 }
 0x163   :  { %v940_v13 = vpop.f32.mrf.mxu1 }
 0x164   :  { %v941_v60 = vadd.f32 %v940_v13, %v884_v62  ;;  %v1021_v21 = vpop.f32.mrf.mxu2  ;;  %v4073_v1 = vand.u32 4294901760, %v1078_v34  ;;  %v1377_v62 = vand.u32 4294901760, %v1376_v38  ;;  %v4118_v13 = vand.u32 4294901760, %v1688_v33 }
 0x165   :  { %v1816_v15 = vand.u32 4294901760, %v1815_v26 }
 0x166   :  { %v1022_v54 = vadd.f32 %v1021_v21, %v941_v60  ;;  %v1370_v58 = vsub.f32 %v1078_v34, %v4073_v1  ;;  %v4903_v34 = vand.u32 4294901760, %v4097_v52  ;;  %v1383_v21 = vand.u32 4294901760, %v1382_v20 }
 0x167   :  { %v1378_v45 = vsub.f32 %v1376_v38, %v1377_v62  ;;  %v4133_v18 = vsub.f32 %v1688_v33, %v4118_v13 }
 0x168   :  { %v1071_v35 = vadd.f32 %v1070_v49, %v1022_v54  ;;  %v1371_v9 = vand.u32 4294901760, %v1370_v58  ;;  %v1685_v49 = vsel %vm96_vm0, %v1630_v3, 0  ;;  %v1384_v41 = vsub.f32 %v1382_v20, %v1383_v21 }
 0x169   :  { %v1379_v26 = vand.u32 4294901760, %v1378_v45  ;;  %v1827_v3 = vsub.f32 %v4115_v11, %v4902_v55 }
 0x16a   :  { %v1080_v6 = vmax.f32 %v1071_v35, 0.0  ;;  %v1372_v60 = vsub.f32 %v1370_v58, %v1371_v9  ;;  %v1821_v35 = vsub.f32 %v4097_v52, %v4903_v34 }
 0x16c   :  { %v4093_v5 = vand.u32 4294901760, %v1080_v6  ;;  %v1822_v33 = vand.u32 4294901760, %v1821_v35  ;;  %v1626_v35 = vld [vmem:[%s4848_s0 + $0x138] sm:$0xff] }
 0x16e   :  { %v1364_v57 = vsub.f32 %v1080_v6, %v4093_v5  ;;  %1327 = vmatpush.msra.mxu2 %v4093_v5  ;;  %1444 = vmatpush.msrb.mxu1 %v4093_v5  ;;  %v4135_v6 = vand.u32 4294901760, %v1685_v49 }
 0x170   :  { %1329 = vmatpush.msra.mxu2 %v4073_v1  ;;  %1410 = vmatpush.msrb.mxu0 %v1364_v57  ;;  %v1365_v25 = vand.u32 4294901760, %v1364_v57 }
 0x171   :  { %1446 = vmatpush.msrb.mxu1 %v4073_v1 }
 0x172   :  { %1331 = vmatpush.msra.mxu2 %v4081_v7  ;;  %1413 = vmatpush.msrb.mxu0 %v1370_v58  ;;  %v1366_v46 = vsub.f32 %v1364_v57, %v1365_v25  ;;  %v1373_v58 = vand.u32 4294901760, %v1372_v60  ;;  %v1628_v57 = vld [vmem:[%s4848_s0 + $0x148] sm:$0xff]  ;;  %v1385_v60 = vand.u32 4294901760, %v1384_v41 }
 0x173   :  { %1448 = vmatpush.msrb.mxu1 %v4081_v7 }
 0x174   :  { %1333 = vmatpush.msra.mxu2 %v4086_v63  ;;  %1416 = vmatpush.msrb.mxu0 %v1376_v38  ;;  %v1367_v54 = vand.u32 4294901760, %v1366_v46  ;;  %v1682_v38 = vsel %vm96_vm0, %v1629_v24, 0 }
 0x175   :  { %1450 = vmatpush.msrb.mxu1 %v4086_v63  ;;  %v4149_v46 = vand.u32 4294901760, %v1682_v38  ;;  %1339 = vmatmul.f32.vlgmr.msra.gmra.mxu2 %v4026_v28 }
 0x176   :  { %1479 = vmatpush.msrb.mxu2 %v1365_v25  ;;  %1368 = vmatpush.msra.mxu3 %v1367_v54  ;;  %v4147_v25 = vsub.f32 %v1685_v49, %v4135_v6 }
 0x177   :  { %1419 = vmatpush.msrb.mxu0 %v1382_v20  ;;  %1817 = vmatpush.xpose.msra.mxu1 %v1816_v15  ;;  %v4900_v20 = vand.u32 4294901760, %v4133_v18  ;;  %v1627_v15 = vld [vmem:[%s4848_s0 + $0x140] sm:$0xff]  ;;  %v4167_v45 = vsub.f32 %v1682_v38, %v4149_v46 }
 0x178   :  { %1483 = vmatpush.msrb.mxu2 %v1371_v9  ;;  %1374 = vmatpush.msra.mxu3 %v1373_v58  ;;  %v1679_v9 = vsel %vm96_vm0, %v1628_v57, 0  ;;  %v4899_v54 = vand.u32 4294901760, %v4147_v25 }
 0x179   :  { %1748 = vmatpush.xpose.msra.mxu0 %v4070_v36  ;;  %v4159_v49 = vand.u32 4294901760, %v1679_v9  ;;  %v1833_v24 = vsub.f32 %v4133_v18, %v4900_v20  ;;  %1454 = vmatmul.f32.vlgmr.msrb.gmra.mxu1 %v4009_v29  ;;  %v4897_v57 = vand.u32 4294901760, %v4167_v45  ;;  %v1648_v29 = vld [vmem:[%s4848_s0 + $0x1e8] sm:$0xff] }
 0x17a   :  { %1487 = vmatpush.msrb.mxu2 %v1377_v62  ;;  %1422 = vmatmul.f32.vlgmr.msrb.gmra.mxu0 %v4003_v53  ;;  %v1828_v62 = vand.u32 4294901760, %v1827_v3  ;;  %v1739_v28 = vsel %vm96_vm0, %v1648_v29, 0  ;;  %v5010_v53 = vand.u32 4294901760, %v4079_v2 }
 0x17b   :  { %1380 = vmatpush.msra.mxu3 %v1379_v26  ;;  %1823 = vmatpush.xpose.msra.mxu1 %v1822_v33  ;;  %v4179_v58 = vsub.f32 %v1679_v9, %v4159_v49  ;;  %v1834_v38 = vand.u32 4294901760, %v1833_v24  ;;  %v1625_v26 = vld [vmem:[%s4848_s0 + $0x130] sm:$0xff]  ;;  %v1845_v9 = vsub.f32 %v4167_v45, %v4897_v57 }
 0x17c   :  { %1491 = vmatpush.msrb.mxu2 %v1383_v21  ;;  %v1676_v21 = vsel %vm96_vm0, %v1627_v15, 0  ;;  %v1624_v15 = vld [vmem:[%s4848_s0 + $0x128] sm:$0xff] }
 0x17d   :  { %1750 = vmatpush.xpose.msra.mxu0 %v4083_v48  ;;  %1386 = vmatpush.msra.mxu3 %v1385_v60  ;;  %v4181_v41 = vand.u32 4294901760, %v1676_v21  ;;  %v4896_v33 = vand.u32 4294901760, %v4179_v58 }
 0x17e   :  { %1927 = vmatpush.xpose.msra.mxu2 %v4079_v2  ;;  %1388 = vmatmul.f32.vlgmr.msra.gmra.mxu3 %v3991_v40 }
 0x17f   :  { %1514 = vmatpush.msrb.mxu3 %v4093_v5  ;;  %1829 = vmatpush.xpose.msra.mxu1 %v1828_v62  ;;  %v1839_v5 = vsub.f32 %v4147_v25, %v4899_v54  ;;  %v4199_v3 = vsub.f32 %v1676_v21, %v4181_v41  ;;  %v1851_v62 = vsub.f32 %v4179_v58, %v4896_v33  ;;  %v1846_v21 = vand.u32 4294901760, %v1845_v9 }
 0x180   :  { %1347 = vmatmul.f32.gmra.mxu2 %v4036_v39 }
 0x181   :  { %1752 = vmatpush.xpose.msra.mxu0 %v4099_v32  ;;  %1516 = vmatpush.msrb.mxu3 %v4073_v1  ;;  %v1673_v1 = vsel %vm96_vm0, %v1626_v35, 0  ;;  %v4898_v24 = vand.u32 4294901760, %v4199_v3  ;;  %v1852_v33 = vand.u32 4294901760, %v1851_v62  ;;  %v1622_v62 = vld [vmem:[%s4848_s0 + $0x118] sm:$0xff] }
 0x182   :  { %1930 = vmatpush.xpose.msra.mxu2 %v4097_v52  ;;  %1427 = vmatmul.f32.gmra.mxu0 %v4021_v30  ;;  %v4205_v60 = vand.u32 4294901760, %v1673_v1  ;;  %v1661_v20 = vsel %vm96_vm0, %v1622_v62, 0 }
 0x183   :  { %1518 = vmatpush.msrb.mxu3 %v4081_v7  ;;  %1835 = vmatpush.xpose.msra.mxu1 %v1834_v38  ;;  %v1840_v7 = vand.u32 4294901760, %v1839_v5  ;;  %v1667_v5 = vsel %vm96_vm0, %v1624_v15, 0  ;;  %v4274_v55 = vand.u32 4294901760, %v1661_v20 }
 0x184   :  { %1460 = vmatmul.f32.gmra.mxu1 %v4029_v37  ;;  %v4221_v35 = vsub.f32 %v1673_v1, %v4205_v60  ;;  %v1857_v1 = vsub.f32 %v4199_v3, %v4898_v24  ;;  %v4240_v15 = vand.u32 4294901760, %v1667_v5 }
 0x185   :  { %1754 = vmatpush.xpose.msra.mxu0 %v4118_v13  ;;  %1520 = vmatpush.msrb.mxu3 %v4086_v63  ;;  %v1670_v63 = vsel %vm96_vm0, %v1625_v26, 0  ;;  %v1623_v26 = vld [vmem:[%s4848_s0 + $0x120] sm:$0xff] }
 0x186   :  { %1933 = vmatpush.xpose.msra.mxu2 %v4115_v11  ;;  %1392 = vmatmul.f32.gmra.mxu3 %v4011_v4  ;;  %v4223_v38 = vand.u32 4294901760, %v1670_v63  ;;  %v1664_v57 = vsel %vm96_vm0, %v1623_v26, 0  ;;  %v4257_v54 = vsub.f32 %v1667_v5, %v4240_v15 }
 0x187   :  { %1995 = vmatpush.xpose.msra.mxu3 %v4070_v36  ;;  %1841 = vmatpush.xpose.msra.mxu1 %v1840_v7  ;;  %v4901_v7 = vand.u32 4294901760, %v4221_v35 }
 0x188   :  { %1493 = vmatmul.f32.vlgmr.msrb.gmra.mxu2 %v3991_v40  ;;  %v4238_v9 = vsub.f32 %v1670_v63, %v4223_v38  ;;  %v1858_v63 = vand.u32 4294901760, %v1857_v1  ;;  %v4908_v62 = vand.u32 4294901760, %v4257_v54 }
 0x189   :  { %1756 = vmatpush.xpose.msra.mxu0 %v4135_v6  ;;  %v1863_v26 = vsub.f32 %v4221_v35, %v4901_v7 }
 0x18a   :  { %1936 = vmatpush.xpose.msra.mxu2 %v4133_v18  ;;  %v4904_v24 = vand.u32 4294901760, %v4238_v9 }
 0x18b   :  { %1997 = vmatpush.xpose.msra.mxu3 %v4083_v48  ;;  %1847 = vmatpush.xpose.msra.mxu1 %v1846_v21  ;;  %v4249_v21 = vand.u32 4294901760, %v1664_v57  ;;  %v1864_v5 = vand.u32 4294901760, %v1863_v26 }
 0x18c   :  { %v1869_v7 = vsub.f32 %v4238_v9, %v4904_v24  ;;  %v1875_v24 = vsub.f32 %v4257_v54, %v4908_v62 }
 0x18d   :  { %1758 = vmatpush.xpose.msra.mxu0 %v4149_v46  ;;  %v4267_v1 = vsub.f32 %v1664_v57, %v4249_v21  ;;  %v1620_v57 = vld [vmem:[%s4848_s0 + $0x108] sm:$0xff] }
 0x18e   :  { %1939 = vmatpush.xpose.msra.mxu2 %v4147_v25  ;;  %1522 = vmatmul.f32.vlgmr.msrb.gmra.mxu3 %v3991_v40  ;;  %v1870_v26 = vand.u32 4294901760, %v1869_v7  ;;  %v1649_v40 = vld [vmem:[%s4848_s0 + $0x1f0] sm:$0xff] }
 0x18f   :  { %1999 = vmatpush.xpose.msra.mxu3 %v4099_v32  ;;  %1853 = vmatpush.xpose.msra.mxu1 %v1852_v33  ;;  %v1621_v33 = vld [vmem:[%s4848_s0 + $0x110] sm:$0xff]  ;;  %v5009_v7 = vand.u32 4294901760, %v4267_v1 }
 0x190   :  { %1497 = vmatmul.f32.gmra.mxu2 %v4011_v4  ;;  %v1658_v34 = vsel %vm96_vm0, %v1621_v33, 0  ;;  %v4289_v33 = vsub.f32 %v1661_v20, %v4274_v55  ;;  %v1876_v20 = vand.u32 4294901760, %v1875_v24 }
 0x191   :  { %1760 = vmatpush.xpose.msra.mxu0 %v4159_v49  ;;  %v4291_v8 = vand.u32 4294901760, %v1658_v34 }
 0x192   :  { %1942 = vmatpush.xpose.msra.mxu2 %v4167_v45  ;;  %v4915_v62 = vand.u32 4294901760, %v4289_v33 }
 0x193   :  { %2001 = vmatpush.xpose.msra.mxu3 %v4118_v13  ;;  %1859 = vmatpush.xpose.msra.mxu1 %v1858_v63  ;;  %v1619_v63 = vld [vmem:[%s4848_s0 + $0x100] sm:$0xff] }
 0x194   :  { %v1652_v39 = vsel %vm96_vm0, %v1619_v63, 0  ;;  %v1887_v24 = vsub.f32 %v4289_v33, %v4915_v62 }
 0x195   :  { %1762 = vmatpush.xpose.msra.mxu0 %v4181_v41 }
 0x196   :  { %1945 = vmatpush.xpose.msra.mxu2 %v4179_v58  ;;  %1526 = vmatmul.f32.gmra.mxu3 %v4011_v4  ;;  %v1655_v4 = vsel %vm96_vm0, %v1620_v57, 0  ;;  %v4305_v57 = vsub.f32 %v1658_v34, %v4291_v8  ;;  %v1888_v63 = vand.u32 4294901760, %v1887_v24 }
 0x197   :  { %2003 = vmatpush.xpose.msra.mxu3 %v4135_v6  ;;  %1865 = vmatpush.xpose.msra.mxu1 %v1864_v5  ;;  %v1881_v5 = vsub.f32 %v4267_v1, %v5009_v7  ;;  %v4307_v37 = vand.u32 4294901760, %v1655_v4  ;;  %v4320_v7 = vand.u32 4294901760, %v1652_v39 }
 0x199   :  { %1764 = vmatpush.xpose.msra.mxu0 %v4205_v60  ;;  %v1882_v30 = vand.u32 4294901760, %v1881_v5  ;;  %v4318_v34 = vsub.f32 %v1655_v4, %v4307_v37  ;;  %v4330_v62 = vsub.f32 %v1652_v39, %v4320_v7  ;;  %v1650_v4 = vld [vmem:[%s4848_s0 + $0x1f8] sm:$0xff] }
 0x19a   :  { %1948 = vmatpush.xpose.msra.mxu2 %v4199_v3  ;;  %v1745_v39 = vsel %vm96_vm0, %v1650_v4, 0  ;;  %v1742_v4 = vsel %vm96_vm0, %v1649_v40, 0  ;;  %v1647_v40 = vld [vmem:[%s4848_s0 + $0x1e0] sm:$0xff] }
 0x19b   :  { %2005 = vmatpush.xpose.msra.mxu3 %v4149_v46  ;;  %1871 = vmatpush.xpose.msra.mxu1 %v1870_v26  ;;  %v4916_v26 = vand.u32 4294901760, %v4305_v57 }
 0x19d   :  { %1766 = vmatpush.xpose.msra.mxu0 %v4223_v38  ;;  %v1893_v5 = vsub.f32 %v4305_v57, %v4916_v26  ;;  %v4922_v26 = vand.u32 4294901760, %v4330_v62 }
 0x19e   :  { %1951 = vmatpush.xpose.msra.mxu2 %v4221_v35 }
 0x19f   :  { %2007 = vmatpush.xpose.msra.mxu3 %v4159_v49  ;;  %1877 = vmatpush.xpose.msra.mxu1 %v1876_v20  ;;  %v4919_v20 = vand.u32 4294901760, %v4318_v34 }
 0x1a1   :  { %1768 = vmatpush.xpose.msra.mxu0 %v4240_v15  ;;  %v1899_v24 = vsub.f32 %v4318_v34, %v4919_v20  ;;  %v4352_v20 = vand.u32 4294901760, %v1745_v39 }
 0x1a2   :  { %1954 = vmatpush.xpose.msra.mxu2 %v4238_v9 }
 0x1a3   :  { %2009 = vmatpush.xpose.msra.mxu3 %v4181_v41  ;;  %1883 = vmatpush.xpose.msra.mxu1 %v1882_v30  ;;  %v1894_v30 = vand.u32 4294901760, %v1893_v5  ;;  %v1905_v5 = vsub.f32 %v4330_v62, %v4922_v26  ;;  %v4364_v26 = vand.u32 4294901760, %v1742_v4 }
 0x1a5   :  { %1770 = vmatpush.xpose.msra.mxu0 %v4249_v21 }
 0x1a6   :  { %1957 = vmatpush.xpose.msra.mxu2 %v4257_v54 }
 0x1a7   :  { %2011 = vmatpush.xpose.msra.mxu3 %v4205_v60  ;;  %1889 = vmatpush.xpose.msra.mxu1 %v1888_v63  ;;  %v1900_v63 = vand.u32 4294901760, %v1899_v24  ;;  %v4362_v24 = vsub.f32 %v1745_v39, %v4352_v20  ;;  %v4377_v39 = vand.u32 4294901760, %v1739_v28 }
 0x1a9   :  { %1772 = vmatpush.xpose.msra.mxu0 %v4274_v55  ;;  %v4929_v29 = vand.u32 4294901760, %v4362_v24  ;;  %v4402_v16 = vsub.f32 %v1739_v28, %v4377_v39 }
 0x1aa   :  { %1960 = vmatpush.xpose.msra.mxu2 %v4267_v1 }
 0x1ab   :  { %2013 = vmatpush.xpose.msra.mxu3 %v4223_v38  ;;  %1895 = vmatpush.xpose.msra.mxu1 %v1894_v30  ;;  %v1906_v30 = vand.u32 4294901760, %v1905_v5  ;;  %v4382_v5 = vsub.f32 %v1742_v4, %v4364_v26  ;;  %v2249_v4 = vsub.f32 %v4362_v24, %v4929_v29  ;;  %v4935_v43 = vand.u32 4294901760, %v4402_v16 }
 0x1ad   :  { %1774 = vmatpush.xpose.msra.mxu0 %v4291_v8  ;;  %v2250_v28 = vand.u32 4294901760, %v2249_v4  ;;  %v5013_v4 = vand.u32 4294901760, %v4133_v18 }
 0x1ae   :  { %1963 = vmatpush.xpose.msra.mxu2 %v4289_v33 }
 0x1af   :  { %2015 = vmatpush.xpose.msra.mxu3 %v4240_v15  ;;  %1901 = vmatpush.xpose.msra.mxu1 %v1900_v63  ;;  %v1736_v63 = vsel %vm96_vm0, %v1647_v40, 0 }
 0x1b0   :  { %v4392_v2 = vand.u32 4294901760, %v1736_v63 }
 0x1b1   :  { %1776 = vmatpush.xpose.msra.mxu0 %v4307_v37 }
 0x1b2   :  { %1966 = vmatpush.xpose.msra.mxu2 %v4305_v57  ;;  %v4414_v29 = vsub.f32 %v1736_v63, %v4392_v2  ;;  %v1644_v63 = vld [vmem:[%s4848_s0 + $0x1c8] sm:$0xff] }
 0x1b3   :  { %2017 = vmatpush.xpose.msra.mxu3 %v4249_v21  ;;  %1907 = vmatpush.xpose.msra.mxu1 %v1906_v30  ;;  %v4932_v30 = vand.u32 4294901760, %v4382_v5  ;;  %v1727_v18 = vsel %vm96_vm0, %v1644_v63, 0 }
 0x1b4   :  { %v4455_v63 = vand.u32 4294901760, %v1727_v18 }
 0x1b5   :  { %1778 = vmatpush.xpose.msra.mxu0 %v4320_v7 }
 0x1b6   :  { %1969 = vmatpush.xpose.msra.mxu2 %v4318_v34  ;;  %1909 = vmatmul.f32.vlgmr.msra.gmra.mxu1 %v3532_v31  ;;  %v4478_v10 = vsub.f32 %v1727_v18, %v4455_v63 }
 0x1b7   :  { %2019 = vmatpush.xpose.msra.mxu3 %v4274_v55  ;;  %2133 = vmatpush.xpose.msrb.mxu1 %v4070_v36  ;;  %v5011_v36 = vand.u32 4294901760, %v4097_v52  ;;  %v1645_v52 = vld [vmem:[%s4848_s0 + $0x1d0] sm:$0xff] }
 0x1b8   :  { %1784 = vmatmul.f32.vlgmr.msra.gmra.mxu0 %v3583_v50 }
 0x1b9   :  { %2054 = vmatpush.xpose.msrb.mxu0 %v5010_v53  ;;  %v1646_v53 = vld [vmem:[%s4848_s0 + $0x1d8] sm:$0xff] }
 0x1ba   :  { %1972 = vmatpush.xpose.msra.mxu2 %v4330_v62  ;;  %v1733_v40 = vsel %vm96_vm0, %v1646_v53, 0  ;;  %v2255_v53 = vsub.f32 %v4382_v5, %v4932_v30 }
 0x1bb   :  { %2021 = vmatpush.xpose.msra.mxu3 %v4291_v8  ;;  %2135 = vmatpush.xpose.msrb.mxu1 %v4083_v48  ;;  %v5012_v48 = vand.u32 4294901760, %v4115_v11  ;;  %v1730_v11 = vsel %vm96_vm0, %v1645_v52, 0  ;;  %v2261_v52 = vsub.f32 %v4402_v16, %v4935_v43 }
 0x1bc   :  { %v4439_v17 = vand.u32 4294901760, %v1730_v11 }
 0x1bd   :  { %2058 = vmatpush.xpose.msrb.mxu0 %v5011_v36  ;;  %1975 = vmatmul.f32.vlgmr.msra.gmra.mxu2 %v4989_v56  ;;  %v4411_v36 = vand.u32 4294901760, %v1733_v40 }
 0x1be   :  { %2182 = vmatpush.xpose.msrb.mxu2 %v4352_v20  ;;  %1913 = vmatmul.f32.gmra.mxu1 %v3585_v61  ;;  %v4458_v43 = vsub.f32 %v1730_v11, %v4439_v17 }
 0x1bf   :  { %2023 = vmatpush.xpose.msra.mxu3 %v4307_v37  ;;  %2137 = vmatpush.xpose.msrb.mxu1 %v4099_v32  ;;  %v4433_v30 = vsub.f32 %v1733_v40, %v4411_v36  ;;  %v2256_v32 = vand.u32 4294901760, %v2255_v53  ;;  %v1643_v40 = vld [vmem:[%s4848_s0 + $0x1c0] sm:$0xff] }
 0x1c0   :  { %1792 = vmatmul.f32.gmra.mxu0 %v3636_v47 }
 0x1c1   :  { %2062 = vmatpush.xpose.msrb.mxu0 %v5012_v48  ;;  %v4936_v48 = vand.u32 4294901760, %v4414_v29 }
 0x1c2   :  { %2184 = vmatpush.xpose.msrb.mxu2 %v4364_v26 }
 0x1c3   :  { %2025 = vmatpush.xpose.msra.mxu3 %v4320_v7  ;;  %2139 = vmatpush.xpose.msrb.mxu1 %v4118_v13  ;;  %v2267_v53 = vsub.f32 %v4414_v29, %v4936_v48  ;;  %v2262_v13 = vand.u32 4294901760, %v2261_v52 }
 0x1c5   :  { %2066 = vmatpush.xpose.msrb.mxu0 %v5013_v4  ;;  %1980 = vmatmul.f32.gmra.mxu2 %v4990_v59  ;;  %v4939_v4 = vand.u32 4294901760, %v4433_v30  ;;  %v2268_v52 = vand.u32 4294901760, %v2267_v53  ;;  %v5016_v53 = vand.u32 4294901760, %v4179_v58 }
 0x1c6   :  { %2186 = vmatpush.xpose.msrb.mxu2 %v4377_v39  ;;  %2029 = vmatmul.f32.vlgmr.msra.gmra.mxu3 %v4991_v22  ;;  %v5024_v22 = vand.u32 4294901760, %v4267_v1 }
 0x1c7   :  { %2251 = vmatpush.xpose.msrb.mxu3 %v2250_v28  ;;  %v5014_v28 = vand.u32 4294901760, %v4147_v25  ;;  %2141 = vmatpush.xpose.msrb.mxu1 %v4135_v6  ;;  %v1724_v25 = vsel %vm96_vm0, %v1643_v40, 0  ;;  %v2273_v11 = vsub.f32 %v4433_v30, %v4939_v4  ;;  %v4940_v40 = vand.u32 4294901760, %v4458_v43  ;;  %v1124_v4 = vpop.f32.mrf.mxu0 }
 0x1c8   :  { %1800 = vmatmul.f32.gmra.mxu0 %v3690_v27  ;;  %1917 = vmatmul.f32.gmra.mxu1 %v3638_v14  ;;  %v4473_v6 = vand.u32 4294901760, %v1724_v25 }
 0x1c9   :  { %2070 = vmatpush.xpose.msrb.mxu0 %v5014_v28  ;;  %v1642_v28 = vld [vmem:[%s4848_s0 + $0x1b8] sm:$0xff]  ;;  %v2274_v18 = vand.u32 4294901760, %v2273_v11  ;;  %v5017_v11 = vand.u32 4294901760, %v4199_v3 }
 0x1ca   :  { %2188 = vmatpush.xpose.msrb.mxu2 %v4392_v2  ;;  %v1721_v48 = vsel %vm96_vm0, %v1642_v28, 0  ;;  %v4943_v28 = vand.u32 4294901760, %v4478_v10 }
 0x1cb   :  { %2257 = vmatpush.xpose.msrb.mxu3 %v2256_v32  ;;  %v5015_v32 = vand.u32 4294901760, %v4167_v45  ;;  %2143 = vmatpush.xpose.msrb.mxu1 %v4149_v46  ;;  %v1641_v45 = vld [vmem:[%s4848_s0 + $0x1b0] sm:$0xff]  ;;  %v2279_v46 = vsub.f32 %v4458_v43, %v4940_v40 }
 0x1cc   :  { %v1718_v58 = vsel %vm96_vm0, %v1641_v45, 0 }
 0x1cd   :  { %2074 = vmatpush.xpose.msrb.mxu0 %v5015_v32  ;;  %1985 = vmatmul.f32.gmra.mxu2 %v4992_v51  ;;  %v4496_v32 = vsub.f32 %v1724_v25, %v4473_v6  ;;  %v2280_v25 = vand.u32 4294901760, %v2279_v46  ;;  %v4514_v45 = vand.u32 4294901760, %v1718_v58  ;;  %v4517_v51 = vpop.f32.mrf.mxu1 }
 0x1ce   :  { %2190 = vmatpush.xpose.msrb.mxu2 %v4411_v36  ;;  %2035 = vmatmul.f32.gmra.mxu3 %v4993_v12  ;;  %v4519_v12 = vpop.permute.xlu2 %1083 }
 0x1cf   :  { %2263 = vmatpush.xpose.msrb.mxu3 %v2262_v13  ;;  %v4488_v13 = vand.u32 4294901760, %v1721_v48  ;;  %2145 = vmatpush.xpose.msrb.mxu1 %v4159_v49  ;;  %v2285_v49 = vsub.f32 %v4478_v10, %v4943_v28  ;;  %v4944_v40 = vand.u32 4294901760, %v4496_v32  ;;  %v4538_v28 = vsub.f32 %v1718_v58, %v4514_v45  ;;  %v1132_v46 = vpop.f32.mrf.mxu0 }
 0x1d0   :  { %1808 = vmatmul.f32.gmra.mxu0 %v3740_v19  ;;  %1921 = vmatmul.f32.gmra.mxu1 %v3692_v23 }
 0x1d1   :  { %2078 = vmatpush.xpose.msrb.mxu0 %v5016_v53  ;;  %v4508_v53 = vsub.f32 %v1721_v48, %v4488_v13  ;;  %v1639_v48 = vld [vmem:[%s4848_s0 + $0x1a0] sm:$0xff] }
 0x1d2   :  { %2192 = vmatpush.xpose.msrb.mxu2 %v4439_v17 }
 0x1d3   :  { %2269 = vmatpush.xpose.msrb.mxu3 %v2268_v52  ;;  %v1640_v52 = vld [vmem:[%s4848_s0 + $0x1a8] sm:$0xff]  ;;  %2147 = vmatpush.xpose.msrb.mxu1 %v4181_v41  ;;  %v2291_v41 = vsub.f32 %v4496_v32, %v4944_v40 }
 0x1d4   :  { %v1715_v3 = vsel %vm96_vm0, %v1640_v52, 0 }
 0x1d5   :  { %2082 = vmatpush.xpose.msrb.mxu0 %v5017_v11  ;;  %1990 = vmatmul.f32.gmra.mxu2 %v4994_v0  ;;  %v2286_v11 = vand.u32 4294901760, %v2285_v49  ;;  %v4535_v52 = vand.u32 4294901760, %v1715_v3  ;;  %v5021_v49 = vand.u32 4294901760, %v4508_v53  ;;  %v2292_v58 = vand.u32 4294901760, %v2291_v41 }
 0x1d6   :  { %2194 = vmatpush.xpose.msrb.mxu2 %v4455_v63  ;;  %2041 = vmatmul.f32.gmra.mxu3 %v4995_v44  ;;  %v1207_v44 = vpop.f32.mrf.mxu2 }
 0x1d7   :  { %2275 = vmatpush.xpose.msrb.mxu3 %v2274_v18  ;;  %v5018_v18 = vand.u32 4294901760, %v4221_v35  ;;  %5019 = vst [vmem:[#allocation26_spill] sm:$0xff] %v4535_v52  ;;  %2149 = vmatpush.xpose.msrb.mxu1 %v4205_v60  ;;  %v1712_v35 = vsel %vm96_vm0, %v1639_v48, 0  ;;  %v2297_v40 = vsub.f32 %v4508_v53, %v5021_v49  ;;  %v4555_v48 = vsub.f32 %v1715_v3, %v4535_v52  ;;  %v4560_v49 = vpop.permute.xlu2 %1088  ;;  %v1637_v60 = vld [vmem:[%s4848_s0 + $0x190] sm:$0xff] }
 0x1d8   :  { %v4551_v0 = vand.u32 4294901760, %v1712_v35 }
 0x1d9   :  { %2086 = vmatpush.xpose.msrb.mxu0 %v5018_v18  ;;  %v1638_v18 = vld [vmem:[%s4848_s0 + $0x198] sm:$0xff]  ;;  %v2298_v41 = vand.u32 4294901760, %v2297_v40  ;;  %v1133_v40 = vadd.f32 %v1132_v46, %v4560_v49 }
 0x1da   :  { %2196 = vmatpush.xpose.msrb.mxu2 %v4473_v6  ;;  %v4575_v59 = vsub.f32 %v1712_v35, %v4551_v0 }
 0x1db   :  { %2281 = vmatpush.xpose.msrb.mxu3 %v2280_v25  ;;  %v5020_v25 = vand.u32 4294901760, %v4238_v9  ;;  %2151 = vmatpush.xpose.msrb.mxu1 %v4223_v38  ;;  %v1709_v9 = vsel %vm96_vm0, %v1638_v18, 0  ;;  %v5023_v38 = vand.u32 4294901760, %v4538_v28 }
 0x1dc   :  { %v4571_v18 = vand.u32 4294901760, %v1709_v9  ;;  %v4954_v46 = vand.u32 4294901760, %v4575_v59 }
 0x1dd   :  { %2090 = vmatpush.xpose.msrb.mxu0 %v5020_v25  ;;  %v1177_v25 = vpop.f32.mrf.mxu1  ;;  %v2303_v3 = vsub.f32 %v4538_v28, %v5023_v38  ;;  %v1636_v38 = vld [vmem:[%s4848_s0 + $0x188] sm:$0xff] }
 0x1de   :  { %2198 = vmatpush.xpose.msrb.mxu2 %v4488_v13  ;;  %2047 = vmatmul.f32.gmra.mxu3 %v4996_v42  ;;  %v4953_v42 = vand.u32 4294901760, %v4555_v48  ;;  %v1178_v1 = vadd.f32 %v1177_v25, %v1133_v40  ;;  %v1703_v56 = vsel %vm96_vm0, %v1636_v38, 0 }
 0x1df   :  { %2287 = vmatpush.xpose.msrb.mxu3 %v2286_v11  ;;  %v5022_v11 = vand.u32 4294901760, %v4257_v54  ;;  %v1239_v54 = vpop.f32.mrf.mxu3  ;;  %2153 = vmatpush.xpose.msrb.mxu1 %v4240_v15  ;;  %v2304_v35 = vand.u32 4294901760, %v2303_v3  ;;  %v1635_v3 = vld [vmem:[%s4848_s0 + $0x180] sm:$0xff]  ;;  %s3191_s0 = smov [#allocation3]  }
 0x1e0   :  { %v2309_v15 = vsub.f32 %v4555_v48, %v4953_v42  ;;  %s3128_s22 = sshll.u32 %s3191_s0, 4  ;;  %s3129_s22 = int_to_ptr.vmem [resolvable:$true] %s3128_s22 }
 0x1e1   :  { %2094 = vmatpush.xpose.msrb.mxu0 %v5022_v11  ;;  %v1706_v11 = vsel %vm96_vm0, %v1637_v60, 0  ;;  %v4592_v60 = vsub.f32 %v1709_v9, %v4571_v18 }
 0x1e2   :  { %2200 = vmatpush.xpose.msrb.mxu2 %v4514_v45  ;;  %v2310_v9 = vand.u32 4294901760, %v2309_v15 }
 0x1e3   :  { %2293 = vmatpush.xpose.msrb.mxu3 %v2292_v58  ;;  %v1125_v58 = vadd.f32 %v1124_v4, %v4519_v12  ;;  %v1278_v4 = vpop.f32.mrf.mxu0  ;;  %2155 = vmatpush.xpose.msrb.mxu1 %v4249_v21  ;;  %v2315_v21 = vsub.f32 %v4575_v59, %v4954_v46  ;;  %v2320_v25 = vand.u32 4294901760, %v4592_v60 }
 0x1e5   :  { %2098 = vmatpush.xpose.msrb.mxu0 %v5024_v22  ;;  %v4595_v22 = vand.u32 4294901760, %v1706_v11  ;;  %v1174_v42 = vadd.f32 %v4517_v51, %v1125_v58  ;;  %v1307_v40 = vpop.f32.mrf.mxu1  ;;  %v1700_v51 = vsel %vm96_vm0, %v1635_v3, 0  ;;  %v2316_v46 = vand.u32 4294901760, %v2315_v21 }
 0x1e6   :  { %2202 = vmatpush.xpose.msrb.mxu2 %v4535_v52  ;;  %v1212_v52 = vpop.f32.mrf.mxu2 }
 0x1e7   :  { %2299 = vmatpush.xpose.msrb.mxu3 %v2298_v41  ;;  %v5025_v41 = vand.u32 4294901760, %v4289_v33  ;;  %2157 = vmatpush.xpose.msrb.mxu1 %v4274_v55  ;;  %v4610_v33 = vand.u32 4294901760, %v1703_v56  ;;  %v4613_v38 = vsub.f32 %v1706_v11, %v4595_v22  ;;  %v1245_v58 = vpop.f32.mrf.mxu3  ;;  %v1208_v15 = vadd.f32 %v1207_v44, %v1174_v42 }
 0x1e8   :  { %v2321_v55 = vsub.f32 %v4592_v60, %v2320_v25  ;;  %v4623_v11 = vand.u32 4294901760, %v1700_v51  ;;  %v5027_v44 = vand.u32 4294901760, %v4318_v34  ;;  %v5028_v34 = vand.u32 4294901760, %v4330_v62 }
 0x1e9   :  { %2102 = vmatpush.xpose.msrb.mxu0 %v5025_v41  ;;  %v1213_v41 = vadd.f32 %v1212_v52, %v1178_v1  ;;  %v2326_v52 = vand.u32 4294901760, %v4613_v38  ;;  %v4627_v1 = vsub.f32 %v1703_v56, %v4610_v33  ;;  %v1240_v42 = vadd.f32 %v1239_v54, %v1208_v15 }
 0x1ea   :  { %2204 = vmatpush.xpose.msrb.mxu2 %v4551_v0  ;;  %v4638_v56 = vsub.f32 %v1700_v51, %v4623_v11 }
 0x1eb   :  { %2305 = vmatpush.xpose.msrb.mxu3 %v2304_v35  ;;  %v5026_v35 = vand.u32 4294901760, %v4305_v57  ;;  %2159 = vmatpush.xpose.msrb.mxu1 %v4291_v8  ;;  %v1246_v57 = vadd.f32 %v1245_v58, %v1213_v41  ;;  %v1282_v3 = vpop.f32.mrf.mxu0  ;;  %v2327_v8 = vsub.f32 %v4613_v38, %v2326_v52  ;;  %v2332_v21 = vand.u32 4294901760, %v4627_v1 }
 0x1ec   :  { %v1279_v54 = vadd.f32 %v1278_v4, %v1240_v42  ;;  %v2338_v51 = vand.u32 4294901760, %v4638_v56  ;;  %v5030_v42 = vand.u32 4294901760, %v4382_v5 }
 0x1ed   :  { %2106 = vmatpush.xpose.msrb.mxu0 %v5026_v35  ;;  %v1283_v41 = vadd.f32 %v1282_v3, %v1246_v57  ;;  %v1311_v58 = vpop.f32.mrf.mxu1  ;;  %v4661_v57 = vpop.permute.xlu1 %1541 }
 0x1ee   :  { %2206 = vmatpush.xpose.msrb.mxu2 %v4571_v18  ;;  %v1308_v62 = vadd.f32 %v1307_v40, %v1279_v54  ;;  %v2339_v4 = vsub.f32 %v4638_v56, %v2338_v51 }
 0x1ef   :  { %2311 = vmatpush.xpose.msrb.mxu3 %v2310_v9  ;;  %v2322_v9 = vand.u32 4294901760, %v2321_v55  ;;  %2161 = vmatpush.xpose.msrb.mxu1 %v4307_v37  ;;  %v2328_v37 = vand.u32 4294901760, %v2327_v8  ;;  %v1312_v35 = vadd.f32 %v1311_v58, %v1283_v41  ;;  %v5029_v55 = vand.u32 4294901760, %v4362_v24 }
 0x1f0   :  { %v1530_v40 = vmax.f32 %v1308_v62, 0.0  ;;  %v2340_v3 = vand.u32 4294901760, %v2339_v4  ;;  %v5031_v41 = vand.u32 4294901760, %v4402_v16  ;;  %v5033_v62 = vand.u32 4294901760, %v4433_v30 }
 0x1f1   :  { %2110 = vmatpush.xpose.msrb.mxu0 %v5027_v44  ;;  %v1532_v15 = vmax.f32 %v1312_v35, 0.0 }
 0x1f2   :  { %2208 = vmatpush.xpose.msrb.mxu2 %v4595_v22 }
 0x1f3   :  { %2317 = vmatpush.xpose.msrb.mxu3 %v2316_v46  ;;  %2163 = vmatpush.xpose.msrb.mxu1 %v4320_v7  ;;  %v2333_v46 = vsub.f32 %v4627_v1, %v2332_v21  ;;  %v1546_v44 = vmul.f32 %v4661_v57, %v1532_v15 }
 0x1f5   :  { %2114 = vmatpush.xpose.msrb.mxu0 %v5028_v34  ;;  %v2334_v7 = vand.u32 4294901760, %v2333_v46 }
 0x1f6   :  { %2210 = vmatpush.xpose.msrb.mxu2 %v4610_v33  ;;  %2165 = vmatmul.f32.vlgmr.msrb.gmra.mxu1 %v3532_v31 }
 0x1f7   :  { %2323 = vmatpush.xpose.msrb.mxu3 %v2322_v9  ;;  %2429 = vmatpush.xpose.msra.mxu1 %v4352_v20  ;;  %v1423_v58 = vpop.f32.mrf.mxu0 }
 0x1f8   :  { %2116 = vmatmul.f32.vlgmr.msrb.gmra.mxu0 %v3532_v31  ;;  %v1340_v9 = vpop.f32.mrf.mxu2 }
 0x1f9   :  { %2361 = vmatpush.xpose.msra.mxu0 %v4362_v24  ;;  %v4668_v24 = vpop.permute.xlu0 %1536  ;;  %v1341_v34 = vadd.f32 %v1340_v9, %v4519_v12 }
 0x1fa   :  { %2212 = vmatpush.xpose.msrb.mxu2 %v4623_v11 }
 0x1fb   :  { %2329 = vmatpush.xpose.msrb.mxu3 %v2328_v37  ;;  %2431 = vmatpush.xpose.msra.mxu1 %v4364_v26  ;;  %v5032_v37 = vand.u32 4294901760, %v4414_v29 }
 0x1fd   :  { %2364 = vmatpush.xpose.msra.mxu0 %v4382_v5  ;;  %2218 = vmatmul.f32.vlgmr.msrb.gmra.mxu2 %v3583_v50  ;;  %v1544_v50 = vmul.f32 %v4668_v24, %v1530_v40 }
 0x1fe   :  { %2488 = vmatpush.xpose.msra.mxu2 %v5029_v55  ;;  %2169 = vmatmul.f32.gmra.mxu1 %v3585_v61  ;;  %v5034_v55 = vand.u32 4294901760, %v4458_v43 }
 0x1ff   :  { %2335 = vmatpush.xpose.msrb.mxu3 %v2334_v7  ;;  %2433 = vmatpush.xpose.msra.mxu1 %v4377_v39  ;;  %v1548_v8 = vadd.f32 %v1546_v44, %v1544_v50  ;;  %v1428_v4 = vpop.f32.mrf.mxu0  ;;  %v5035_v44 = vand.u32 4294901760, %v4478_v10  ;;  %v5036_v50 = vand.u32 4294901760, %v4496_v32 }
 0x200   :  { %2120 = vmatmul.f32.gmra.mxu0 %v3585_v61 }
 0x201   :  { %2367 = vmatpush.xpose.msra.mxu0 %v4402_v16  ;;  %v1389_v5 = vpop.f32.mrf.mxu3  ;;  %v1549_v54 = vrot.slane %v1548_v8, 4 }
 0x202   :  { %2492 = vmatpush.xpose.msra.mxu2 %v5030_v42 }
 0x203   :  { %2341 = vmatpush.xpose.msrb.mxu3 %v2340_v3  ;;  %2435 = vmatpush.xpose.msra.mxu1 %v4392_v2  ;;  %v1348_v16 = vpop.f32.mrf.mxu2  ;;  %v1550_v35 = vadd.f32 %v1549_v54, %v1548_v8 }
 0x204   :  { %v1349_v46 = vadd.f32 %v1348_v16, %v4560_v49  ;;  %v5038_v16 = vand.u32 4294901760, %v4538_v28 }
 0x205   :  { %2370 = vmatpush.xpose.msra.mxu0 %v4414_v29  ;;  %2226 = vmatmul.f32.gmra.mxu2 %v3636_v47  ;;  %v1390_v47 = vadd.f32 %v1389_v5, %v1341_v34  ;;  %v1551_v15 = vrot.slane %v1550_v35, 2 }
 0x206   :  { %2496 = vmatpush.xpose.msra.mxu2 %v5031_v41  ;;  %2343 = vmatmul.f32.vlgmr.msrb.gmra.mxu3 %v3532_v31 }
 0x207   :  { %2567 = vmatpush.xpose.msra.mxu3 %v4352_v20  ;;  %2437 = vmatpush.xpose.msra.mxu1 %v4411_v36  ;;  %v1455_v20 = vpop.f32.mrf.mxu1  ;;  %v1424_v7 = vadd.f32 %v1423_v58, %v1390_v47  ;;  %v1552_v3 = vadd.f32 %v1551_v15, %v1550_v35  ;;  %v5037_v58 = vand.u32 4294901760, %v4508_v53  ;;  %v5040_v35 = vand.u32 4294901760, %v4555_v48 }
 0x208   :  { %2124 = vmatmul.f32.gmra.mxu0 %v3638_v14  ;;  %2173 = vmatmul.f32.gmra.mxu1 %v3638_v14 }
 0x209   :  { %2373 = vmatpush.xpose.msra.mxu0 %v4433_v30  ;;  %v1456_v30 = vadd.f32 %v1455_v20, %v1424_v7  ;;  %v1553_v9 = vrot.slane %v1552_v3, 1 }
 0x20a   :  { %2500 = vmatpush.xpose.msra.mxu2 %v5032_v37 }
 0x20b   :  { %2569 = vmatpush.xpose.msra.mxu3 %v4364_v26  ;;  %2439 = vmatpush.xpose.msra.mxu1 %v4439_v17  ;;  %v1393_v26 = vpop.f32.mrf.mxu3 }
 0x20c   :  { %v1394_v29 = vadd.f32 %v1393_v26, %v1349_v46 }
 0x20d   :  { %2376 = vmatpush.xpose.msra.mxu0 %v4458_v43  ;;  %2234 = vmatmul.f32.gmra.mxu2 %v3690_v27 }
 0x20e   :  { %2504 = vmatpush.xpose.msra.mxu2 %v5033_v62  ;;  %2347 = vmatmul.f32.gmra.mxu3 %v3585_v61  ;;  %v1429_v27 = vadd.f32 %v1428_v4, %v1394_v29  ;;  %v5041_v62 = vand.u32 4294901760, %v4575_v59  ;;  %v5045_v4 = vld [vmem:[#allocation9_spill] sm:$0xff] }
 0x20f   :  { %2571 = vmatpush.xpose.msra.mxu3 %v4377_v39  ;;  %2441 = vmatpush.xpose.msra.mxu1 %v4455_v63  ;;  %v1494_v39 = vpop.f32.mrf.mxu2  ;;  %v1461_v40 = vpop.f32.mrf.mxu1 }
 0x210   :  { %2128 = vmatmul.f32.gmra.mxu0 %v3692_v23  ;;  %2177 = vmatmul.f32.gmra.mxu1 %v3692_v23  ;;  %v1462_v42 = vadd.f32 %v1461_v40, %v1429_v27 }
 0x211   :  { %2379 = vmatpush.xpose.msra.mxu0 %v4478_v10  ;;  %v1565_v10 = vpop.permute.xlu2 %1564 }
 0x212   :  { %2508 = vmatpush.xpose.msra.mxu2 %v5034_v55  ;;  %v4716_v5 = vperm.slane %v1565_v10, 0 }
 0x213   :  { %2573 = vmatpush.xpose.msra.mxu3 %v4392_v2  ;;  %2443 = vmatpush.xpose.msra.mxu1 %v4473_v6  ;;  %v1523_v43 = vpop.f32.mrf.mxu3  ;;  %v1495_v2 = vadd.f32 %v1494_v39, %v1456_v30  ;;  %v5047_v39 = vld [vmem:[#allocation12_spill] sm:$0xff] }
 0x215   :  { %2382 = vmatpush.xpose.msra.mxu0 %v4496_v32  ;;  %2242 = vmatmul.f32.gmra.mxu2 %v3740_v19  ;;  %v1524_v8 = vadd.f32 %v1523_v43, %v1495_v2  ;;  %v1554_v19 = vadd.f32 %v1553_v9, %v1552_v3  ;;  %v1614_v2 = vlaneseq  ;;  %v5050_v9 = vld [vmem:[#allocation13_spill] sm:$0xff] }
 0x216   :  { %2512 = vmatpush.xpose.msra.mxu2 %v5035_v44  ;;  %2351 = vmatmul.f32.gmra.mxu3 %v3638_v14 }
 0x217   :  { %2575 = vmatpush.xpose.msra.mxu3 %v4411_v36  ;;  %2445 = vmatpush.xpose.msra.mxu1 %v4488_v13  ;;  %v1498_v36 = vpop.f32.mrf.mxu2  ;;  %v1568_v54 = vadd.f32 %v4716_v5, %v1554_v19  ;;  %vm4781_vm11 = vcmp.lt.s32.totalorder %v1614_v2, 256 }
 0x218   :  { %v1499_v41 = vadd.f32 %v1498_v36, %v1462_v42 }
 0x219   :  { %2385 = vmatpush.xpose.msra.mxu0 %v4508_v53  ;;  %v5039_v53 = vld [vmem:[#allocation26_spill] sm:$0xff]  ;;  %v3139_v47 = vmul.f32 -1.442695, %v1568_v54 }
 0x21a   :  { %2516 = vmatpush.xpose.msra.mxu2 %v5036_v50 }
 0x21b   :  { %2577 = vmatpush.xpose.msra.mxu3 %v4439_v17  ;;  %2447 = vmatpush.xpose.msra.mxu1 %v4514_v45  ;;  %v1527_v32 = vpop.f32.mrf.mxu3  ;;  %v1531_v17 = vmax.f32 %v1524_v8, 0.0  ;;  %3148 = vpow2.f32 %v3139_v47 }
 0x21c   :  { %v1528_v34 = vadd.f32 %v1527_v32, %v1499_v41  ;;  %v5051_v41 = vld [vmem:[#allocation14_spill] sm:$0xff] }
 0x21d   :  { %2388 = vmatpush.xpose.msra.mxu0 %v4538_v28 }
 0x21e   :  { %2520 = vmatpush.xpose.msra.mxu2 %v5037_v58  ;;  %2355 = vmatmul.f32.gmra.mxu3 %v3692_v23  ;;  %v1533_v37 = vmax.f32 %v1528_v34, 0.0 }
 0x21f   :  { %2579 = vmatpush.xpose.msra.mxu3 %v4455_v63  ;;  %2449 = vmatpush.xpose.msra.mxu1 %v5039_v53  ;;  %v1545_v63 = vmul.f32 %v4668_v24, %v1531_v17 }
 0x220   :  { %v1547_v20 = vmul.f32 %v4661_v57, %v1533_v37 }
 0x221   :  { %2391 = vmatpush.xpose.msra.mxu0 %v4555_v48 }
 0x222   :  { %2524 = vmatpush.xpose.msra.mxu2 %v5038_v16  ;;  %v1555_v46 = vadd.f32 %v1547_v20, %v1545_v63 }
 0x223   :  { %2581 = vmatpush.xpose.msra.mxu3 %v4473_v6  ;;  %2451 = vmatpush.xpose.msra.mxu1 %v4551_v0 }
 0x224   :  { %v1556_v28 = vrot.slane %v1555_v46, 4 }
 0x225   :  { %2394 = vmatpush.xpose.msra.mxu0 %v4575_v59 }
 0x226   :  { %2528 = vmatpush.xpose.msra.mxu2 %v5040_v35  ;;  %v1557_v6 = vadd.f32 %v1556_v28, %v1555_v46 }
 0x227   :  { %2583 = vmatpush.xpose.msra.mxu3 %v4488_v13  ;;  %2453 = vmatpush.xpose.msra.mxu1 %v4571_v18  ;;  %v3149_v13 = vpop.eup %3148 }
 0x228   :  { %v1558_v26 = vrot.slane %v1557_v6, 2 }
 0x229   :  { %2397 = vmatpush.xpose.msra.mxu0 %v4592_v60 }
 0x22a   :  { %2532 = vmatpush.xpose.msra.mxu2 %v5041_v62  ;;  %v1559_v48 = vadd.f32 %v1558_v26, %v1557_v6  ;;  %v5054_v26 = vld [vmem:[#allocation15_spill] sm:$0xff] }
 0x22b   :  { %2585 = vmatpush.xpose.msra.mxu3 %v4514_v45  ;;  %2455 = vmatpush.xpose.msra.mxu1 %v4595_v22  ;;  %v1576_v45 = vadd.f32 1.0, %v3149_v13  ;;  %v5055_v13 = vld [vmem:[#allocation17_spill] sm:$0xff] }
 0x22c   :  { %v1560_v29 = vrot.slane %v1559_v48, 1 }
 0x22d   :  { %2400 = vmatpush.xpose.msra.mxu0 %v4613_v38  ;;  %3150 = vrcp.f32 %v1576_v45  ;;  %v5042_v38 = vld [vmem:[#allocation6_spill] sm:$0xff]  ;;  %vm1583_vm4 = vweird.f32 %v1576_v45  ;;  %v1587_v44 = vand.u32 2147483647, %v1576_v45 }
 0x22e   :  { %2536 = vmatpush.xpose.msra.mxu2 %v2320_v25  ;;  %v1561_v59 = vadd.f32 %v1560_v29, %v1559_v48 }
 0x22f   :  { %2587 = vmatpush.xpose.msra.mxu3 %v5039_v53  ;;  %2457 = vmatpush.xpose.msra.mxu1 %v4610_v33  ;;  %vm1588_vm10 = vcmp.eq.f32.partialorder %v1587_v44, 8.507059e+37 }
 0x230   :  { %v1569_v60 = vadd.f32 %v4716_v5, %v1561_v59  ;;  %v5056_v59 = vld [vmem:[#allocation16_spill] sm:$0xff] }
 0x231   :  { %2403 = vmatpush.xpose.msra.mxu0 %v4627_v1 }
 0x232   :  { %2540 = vmatpush.xpose.msra.mxu2 %v2326_v52  ;;  %v3140_v25 = vmul.f32 -1.442695, %v1569_v60 }
 0x233   :  { %2589 = vmatpush.xpose.msra.mxu3 %v4551_v0  ;;  %2459 = vmatpush.xpose.msra.mxu1 %v4623_v11  ;;  %v5043_v0 = vld [vmem:[#allocation7_spill] sm:$0xff]  ;;  %v3151_v52 = vpop.eup %3150  ;;  %v1910_v32 = vpop.f32.mrf.mxu1 }
 0x234   :  { %3152 = vpow2.f32 %v3140_v25  ;;  %v1579_v7 = vmul.f32 %v3151_v52, %v1576_v45  ;;  %vm1584_vm2 = vweird.f32 %v3151_v52 }
 0x235   :  { %2406 = vmatpush.xpose.msra.mxu0 %v4638_v56  ;;  %v5046_v56 = vld [vmem:[#allocation11_spill] sm:$0xff]  ;;  %vm4773_vm5 = vmor %vm1583_vm4, %vm1584_vm2  ;;  %v1785_v36 = vpop.f32.mrf.mxu0 }
 0x236   :  { %2544 = vmatpush.xpose.msra.mxu2 %v2332_v21  ;;  %2463 = vmatmul.f32.vlgmr.msra.gmra.mxu1 %v5043_v0  ;;  %v1580_v15 = vsub.f32 1.0, %v1579_v7  ;;  %v1786_v29 = vadd.f32 %v1785_v36, %v5055_v13 }
 0x237   :  { %2591 = vmatpush.xpose.msra.mxu3 %v4571_v18  ;;  %v5044_v18 = vld [vmem:[#allocation8_spill] sm:$0xff] }
 0x238   :  { %2409 = vmatmul.f32.vlgmr.msra.gmra.mxu0 %v5042_v38  ;;  %v1911_v0 = vadd.f32 %v1910_v32, %v1786_v29 }
 0x23a   :  { %2548 = vmatpush.xpose.msra.mxu2 %v2338_v51  ;;  %v3153_v1 = vpop.eup %3152  ;;  %v1581_v51 = vmul.f32 %v3151_v52, %v1580_v15  ;;  %v5057_v15 = vld [vmem:[#allocation10_spill] sm:$0xff] }
 0x23b   :  { %2593 = vmatpush.xpose.msra.mxu3 %v4595_v22  ;;  %v1577_v21 = vadd.f32 1.0, %v3153_v1  ;;  %v1914_v37 = vpop.f32.mrf.mxu1 }
 0x23c   :  { %v1582_v27 = vadd.f32 %v3151_v52, %v1581_v51 }
 0x23d   :  { %2550 = vmatmul.f32.vlgmr.msra.gmra.mxu2 %v3532_v31  ;;  %3154 = vrcp.f32 %v1577_v21  ;;  %v1604_v30 = vand.u32 2147483648, %v1577_v21  ;;  %v1602_v3 = vand.u32 2147483647, %v1577_v21  ;;  %vm1598_vm6 = vweird.f32 %v1577_v21  ;;  %v1793_v54 = vpop.f32.mrf.mxu0 }
 0x23e   :  { %2469 = vmatmul.f32.gmra.mxu1 %v5045_v4  ;;  %v1586_v50 = vsel %vm4773_vm5, %v3151_v52, %v1582_v27  ;;  %v1794_v48 = vadd.f32 %v1793_v54, %v5054_v26 }
 0x23f   :  { %2595 = vmatpush.xpose.msra.mxu3 %v4610_v33  ;;  %v1605_v42 = vor.u32 1.1754944e-38, %v1604_v30  ;;  %vm1603_vm8 = vcmp.eq.f32.partialorder %v1602_v3, 8.507059e+37 }
 0x240   :  { %2414 = vmatmul.f32.gmra.mxu0 %v5044_v18  ;;  %v1976_v63 = vpop.f32.mrf.mxu2  ;;  %v1915_v25 = vadd.f32 %v1914_v37, %v1794_v48 }
 0x243   :  { %2597 = vmatpush.xpose.msra.mxu3 %v4623_v11  ;;  %v3155_v22 = vpop.eup %3154  ;;  %v1589_v11 = vand.u32 2147483648, %v1576_v45 }
 0x244   :  { %v1594_v55 = vmul.f32 %v3155_v22, %v1577_v21  ;;  %vm1599_vm3 = vweird.f32 %v3155_v22  ;;  %v1977_v21 = vadd.f32 %v1976_v63, %v1911_v0  ;;  %v5060_v0 = vld [vmem:[#allocation20_spill] sm:$0xff] }
 0x245   :  { %2554 = vmatmul.f32.gmra.mxu2 %v3585_v61  ;;  %vm1600_vm7 = vmor %vm1598_vm6, %vm1599_vm3  ;;  %v1590_v8 = vor.u32 1.1754944e-38, %v1589_v11  ;;  %v1801_v16 = vpop.f32.mrf.mxu0  ;;  %v1918_v53 = vpop.f32.mrf.mxu1 }
 0x246   :  { %2599 = vmatmul.f32.vlgmr.msra.gmra.mxu3 %v3532_v31  ;;  %2475 = vmatmul.f32.gmra.mxu1 %v5047_v39  ;;  %v1595_v33 = vsub.f32 1.0, %v1594_v55 }
 0x247   :  { %v1591_v17 = vsel %vm1588_vm10, %v1590_v8, %v1586_v50 }
 0x248   :  { %2419 = vmatmul.f32.gmra.mxu0 %v5046_v56  ;;  %v1596_v40 = vmul.f32 %v3155_v22, %v1595_v33  ;;  %v1981_v35 = vpop.f32.mrf.mxu2 }
 0x249   :  { %v2030_v20 = vpop.f32.mrf.mxu3  ;;  %v1982_v1 = vadd.f32 %v1981_v35, %v1915_v25 }
 0x24a   :  { %v1597_v43 = vadd.f32 %v3155_v22, %v1596_v40  ;;  %v2031_v4 = vadd.f32 %v2030_v20, %v1977_v21  ;;  %v5062_v21 = vld [vmem:[#allocation22_spill] sm:$0xff] }
 0x24c   :  { %v1601_v10 = vsel %vm1600_vm7, %v3155_v22, %v1597_v43 }
 0x24d   :  { %2558 = vmatmul.f32.gmra.mxu2 %v3638_v14  ;;  %v1809_v47 = vpop.f32.mrf.mxu0  ;;  %v1922_v46 = vpop.f32.mrf.mxu1 }
 0x24e   :  { %2603 = vmatmul.f32.gmra.mxu3 %v3585_v61  ;;  %v1606_v61 = vsel %vm1603_vm8, %v1605_v42, %v1601_v10  ;;  %2481 = vmatmul.f32.gmra.mxu1 %v5051_v41  ;;  %v1810_v22 = vadd.f32 %v1809_v47, %v5057_v15 }
 0x24f   :  { %v1610_v19 = vrot.slane %v1606_v61, 7 }
 0x250   :  { %2424 = vmatmul.f32.gmra.mxu0 %v5050_v9  ;;  %v1986_v60 = vpop.f32.mrf.mxu2  ;;  %v1923_v40 = vadd.f32 %v1922_v46, %v1810_v22 }
 0x251   :  { %v1612_v34 = vsel %vm1611_vm9, %v1591_v17, %v1610_v19  ;;  %v2036_v6 = vpop.f32.mrf.mxu3 }
 0x252   :  { %1618 = vst.msk [vmem:[#allocation3] sm:$0x3] %vm4781_vm11, %v1612_v34  ;;  %v2037_v7 = vadd.f32 %v2036_v6, %v1982_v1  ;;  %v5061_v1 = vld [vmem:[#allocation18_spill] sm:$0xff] }
 0x255   :  { %2562 = vmatmul.f32.gmra.mxu2 %v3692_v23 }
 0x256   :  { %2607 = vmatmul.f32.gmra.mxu3 %v3638_v14  ;;  %v1802_v14 = vadd.f32 %v1801_v16, %v5056_v59 }
 0x258   :  { %v1919_v52 = vadd.f32 %v1918_v53, %v1802_v14  ;;  %v1991_v27 = vpop.f32.mrf.mxu2 }
 0x259   :  { %v2042_v38 = vpop.f32.mrf.mxu3  ;;  %v1992_v44 = vadd.f32 %v1991_v27, %v1923_v40 }
 0x25a   :  { %v1987_v18 = vadd.f32 %v1986_v60, %v1919_v52 }
 0x25c   :  { %v2043_v56 = vadd.f32 %v2042_v38, %v1987_v18  ;;  %v5063_v18 = vld [vmem:[#allocation25_spill] sm:$0xff] }
 0x25e   :  { %2611 = vmatmul.f32.gmra.mxu3 %v3692_v23 }
 0x261   :  { %v2048_v31 = vpop.f32.mrf.mxu3 }
 0x262   :  { %v2049_v42 = vadd.f32 %v2048_v31, %v1992_v44 }
 0x273   :  { %v2166_v62 = vpop.f32.mrf.mxu1 }
 0x275   :  { %v2117_v28 = vpop.f32.mrf.mxu0 }
 0x276   :  { %v2118_v39 = vadd.f32 %v2117_v28, %v2031_v4 }
 0x278   :  { %v2167_v43 = vadd.f32 %v2166_v62, %v2118_v39 }
 0x27a   :  { %v2615_v10 = vmax.f32 %v2167_v43, 0.0 }
 0x27b   :  { %v2170_v23 = vpop.f32.mrf.mxu1 }
 0x27c   :  { %v2641_v32 = vand.u32 4294901760, %v2615_v10 }
 0x27d   :  { %v2121_v45 = vpop.f32.mrf.mxu0 }
 0x27e   :  { %v2122_v51 = vadd.f32 %v2121_v45, %v2037_v7  ;;  %v2691_v16 = vsub.f32 %v2615_v10, %v2641_v32  ;;  %v5058_v45 = vld [vmem:[#allocation19_spill] sm:$0xff]  ;;  %v5064_v7 = vld [vmem:[#allocation24_spill] sm:$0xff] }
 0x280   :  { %v2171_v3 = vadd.f32 %v2170_v23, %v2122_v51  ;;  %v4795_v20 = vpop.f32.mrf.mxu2  ;;  %v2692_v6 = vand.u32 4294901760, %v2691_v16  ;;  %v5059_v23 = vld [vmem:[#allocation23_spill] sm:$0xff] }
 0x282   :  { %v2617_v9 = vmax.f32 %v2171_v3, 0.0  ;;  %v2693_v14 = vsub.f32 %v2691_v16, %v2692_v6 }
 0x284   :  { %v2639_v41 = vand.u32 4294901760, %v2617_v9  ;;  %v2694_v52 = vand.u32 4294901760, %v2693_v14 }
 0x285   :  { %v2125_v55 = vpop.f32.mrf.mxu0  ;;  %v2174_v30 = vpop.f32.mrf.mxu1 }
 0x286   :  { %v2126_v33 = vadd.f32 %v2125_v55, %v2043_v56  ;;  %v2685_v54 = vsub.f32 %v2617_v9, %v2639_v41  ;;  %v5065_v56 = vld [vmem:[#allocation21_spill] sm:$0xff] }
 0x288   :  { %v2175_v11 = vadd.f32 %v2174_v30, %v2126_v33  ;;  %v2686_v46 = vand.u32 4294901760, %v2685_v54  ;;  %v2227_v38 = vpop.f32.mrf.mxu2 }
 0x289   :  { %v2344_v60 = vpop.f32.mrf.mxu3  ;;  %v2228_v43 = vadd.f32 %v2227_v38, %v5054_v26 }
 0x28a   :  { %v2619_v2 = vmax.f32 %v2175_v11, 0.0  ;;  %v2687_v48 = vsub.f32 %v2685_v54, %v2686_v46 }
 0x28c   :  { %v2637_v36 = vand.u32 4294901760, %v2619_v2  ;;  %v2688_v25 = vand.u32 4294901760, %v2687_v48 }
 0x28d   :  { %v2129_v50 = vpop.f32.mrf.mxu0  ;;  %v2178_v61 = vpop.f32.mrf.mxu1 }
 0x28e   :  { %v2130_v8 = vadd.f32 %v2129_v50, %v2049_v42  ;;  %v2679_v17 = vsub.f32 %v2619_v2, %v2637_v36  ;;  %v2220_v42 = vadd.f32 %v4795_v20, %v5055_v13 }
 0x290   :  { %v2179_v19 = vadd.f32 %v2178_v61, %v2130_v8  ;;  %v2680_v63 = vand.u32 4294901760, %v2679_v17  ;;  %v2235_v22 = vpop.f32.mrf.mxu2  ;;  %v2345_v8 = vadd.f32 %v2344_v60, %v2220_v42 }
 0x291   :  { %v2348_v4 = vpop.f32.mrf.mxu3  ;;  %v2236_v2 = vadd.f32 %v2235_v22, %v5056_v59 }
 0x292   :  { %v2621_v34 = vmax.f32 %v2179_v19, 0.0  ;;  %v2681_v28 = vsub.f32 %v2679_v17, %v2680_v63  ;;  %v2349_v9 = vadd.f32 %v2348_v4, %v2228_v43 }
 0x294   :  { %v2635_v37 = vand.u32 4294901760, %v2621_v34  ;;  %v2682_v29 = vand.u32 4294901760, %v2681_v28 }
 0x296   :  { %v2673_v53 = vsub.f32 %v2621_v34, %v2635_v37  ;;  %2636 = vmatpush.msrb.mxu0 %v2635_v37  ;;  %2753 = vmatpush.msrb.mxu3 %v2635_v37 }
 0x298   :  { %v2674_v47 = vand.u32 4294901760, %v2673_v53  ;;  %2638 = vmatpush.msrb.mxu0 %v2637_v36  ;;  %2719 = vmatpush.msrb.mxu2 %v2673_v53  ;;  %v2243_v55 = vpop.f32.mrf.mxu2 }
 0x299   :  { %2755 = vmatpush.msrb.mxu3 %v2637_v36  ;;  %v2352_v51 = vpop.f32.mrf.mxu3 }
 0x29a   :  { %v2675_v35 = vsub.f32 %v2673_v53, %v2674_v47  ;;  %2640 = vmatpush.msrb.mxu0 %v2639_v41  ;;  %2722 = vmatpush.msrb.mxu2 %v2679_v17  ;;  %v2353_v50 = vadd.f32 %v2352_v51, %v2236_v2  ;;  %v2244_v17 = vadd.f32 %v2243_v55, %v5057_v15 }
 0x29b   :  { %2757 = vmatpush.msrb.mxu3 %v2639_v41 }
 0x29c   :  { %2642 = vmatpush.msrb.mxu0 %v2641_v32  ;;  %2725 = vmatpush.msrb.mxu2 %v2685_v54  ;;  %v2676_v62 = vand.u32 4294901760, %v2675_v35 }
 0x29d   :  { %2759 = vmatpush.msrb.mxu3 %v2641_v32  ;;  %2648 = vmatmul.f32.vlgmr.msrb.gmra.mxu0 %v5059_v23 }
 0x29e   :  { %2788 = vmatpush.msra.mxu0 %v2674_v47  ;;  %2677 = vmatpush.msrb.mxu1 %v2676_v62 }
 0x29f   :  { %2728 = vmatpush.msrb.mxu2 %v2691_v16  ;;  %2763 = vmatmul.f32.vlgmr.msrb.gmra.mxu3 %v5060_v0 }
 0x2a0   :  { %2792 = vmatpush.msra.mxu0 %v2680_v63  ;;  %2731 = vmatmul.f32.vlgmr.msrb.gmra.mxu2 %v5058_v45 }
 0x2a1   :  { %2683 = vmatpush.msrb.mxu1 %v2682_v29  ;;  %v2356_v27 = vpop.f32.mrf.mxu3 }
 0x2a2   :  { %2796 = vmatpush.msra.mxu0 %v2686_v46  ;;  %v2357_v26 = vadd.f32 %v2356_v27, %v2244_v17 }
 0x2a3   :  { %2689 = vmatpush.msrb.mxu1 %v2688_v25 }
 0x2a4   :  { %2800 = vmatpush.msra.mxu0 %v2692_v6 }
 0x2a5   :  { %2695 = vmatpush.msrb.mxu1 %v2694_v52  ;;  %2656 = vmatmul.f32.gmra.mxu0 %v5063_v18 }
 0x2a6   :  { %2697 = vmatmul.f32.vlgmr.msrb.gmra.mxu1 %v5061_v1 }
 0x2a7   :  { %2823 = vmatpush.msra.mxu1 %v2635_v37  ;;  %2769 = vmatmul.f32.gmra.mxu3 %v5064_v7 }
 0x2a8   :  { %2736 = vmatmul.f32.gmra.mxu2 %v5062_v21 }
 0x2a9   :  { %2825 = vmatpush.msra.mxu1 %v2637_v36 }
 0x2ab   :  { %2827 = vmatpush.msra.mxu1 %v2639_v41 }
 0x2ad   :  { %2829 = vmatpush.msra.mxu1 %v2641_v32  ;;  %2802 = vmatmul.f32.vlgmr.msra.gmra.mxu0 %v5061_v1 }
 0x2ae   :  { %2701 = vmatmul.f32.gmra.mxu1 %v5065_v56 }
 0x2b3   :  { %v2464_v33 = vpop.f32.mrf.mxu1 }
 0x2b5   :  { %v2410_v39 = vpop.f32.mrf.mxu0  ;;  %2806 = vmatmul.f32.gmra.mxu0 %v5065_v56 }
 0x2b6   :  { %2831 = vmatmul.f32.vlgmr.msra.gmra.mxu1 %v5061_v1  ;;  %v2411_v32 = vadd.f32 %v2410_v39, %v2345_v8 }
 0x2b8   :  { %v2465_v16 = vadd.f32 %v2464_v33, %v2411_v32 }
 0x2bb   :  { %v2470_v3 = vpop.f32.mrf.mxu1 }
 0x2bd   :  { %v2415_v40 = vpop.f32.mrf.mxu0 }
 0x2be   :  { %2835 = vmatmul.f32.gmra.mxu1 %v5065_v56  ;;  %v2416_v61 = vadd.f32 %v2415_v40, %v2349_v9 }
 0x2c0   :  { %v2551_v30 = vpop.f32.mrf.mxu2  ;;  %v2471_v34 = vadd.f32 %v2470_v3, %v2416_v61 }
 0x2c1   :  { %v2552_v13 = vadd.f32 %v2551_v30, %v2465_v16 }
 0x2c3   :  { %v2476_v10 = vpop.f32.mrf.mxu1 }
 0x2c5   :  { %v2420_v44 = vpop.f32.mrf.mxu0 }
 0x2c6   :  { %v2421_v41 = vadd.f32 %v2420_v44, %v2353_v50 }
 0x2c8   :  { %v2555_v11 = vpop.f32.mrf.mxu2  ;;  %v2477_v54 = vadd.f32 %v2476_v10, %v2421_v41 }
 0x2c9   :  { %v2600_v31 = vpop.f32.mrf.mxu3  ;;  %v2556_v59 = vadd.f32 %v2555_v11, %v2471_v34 }
 0x2ca   :  { %v2601_v28 = vadd.f32 %v2600_v31, %v2552_v13 }
 0x2cb   :  { %v2482_v35 = vpop.f32.mrf.mxu1 }
 0x2cc   :  { %v2616_v14 = vmax.f32 %v2601_v28, 0.0 }
 0x2cd   :  { %v2425_v37 = vpop.f32.mrf.mxu0 }
 0x2ce   :  { %v2426_v20 = vadd.f32 %v2425_v37, %v2357_v26  ;;  %v2857_v4 = vand.u32 4294901760, %v2616_v14 }
 0x2d0   :  { %v2559_v19 = vpop.f32.mrf.mxu2  ;;  %v2483_v48 = vadd.f32 %v2482_v35, %v2426_v20  ;;  %v2907_v33 = vsub.f32 %v2616_v14, %v2857_v4 }
 0x2d1   :  { %v2604_v36 = vpop.f32.mrf.mxu3  ;;  %v2560_v53 = vadd.f32 %v2559_v19, %v2477_v54 }
 0x2d2   :  { %v2605_v47 = vadd.f32 %v2604_v36, %v2556_v59  ;;  %v2908_v44 = vand.u32 4294901760, %v2907_v33 }
 0x2d4   :  { %v2618_v29 = vmax.f32 %v2605_v47, 0.0  ;;  %v2909_v9 = vsub.f32 %v2907_v33, %v2908_v44 }
 0x2d6   :  { %v2855_v38 = vand.u32 4294901760, %v2618_v29  ;;  %v2910_v10 = vand.u32 4294901760, %v2909_v9 }
 0x2d8   :  { %v2563_v62 = vpop.f32.mrf.mxu2  ;;  %v2901_v55 = vsub.f32 %v2618_v29, %v2855_v38 }
 0x2d9   :  { %v2608_v63 = vpop.f32.mrf.mxu3  ;;  %v2564_v15 = vadd.f32 %v2563_v62, %v2483_v48 }
 0x2da   :  { %v2609_v46 = vadd.f32 %v2608_v63, %v2560_v53  ;;  %v2902_v3 = vand.u32 4294901760, %v2901_v55 }
 0x2dc   :  { %v2620_v6 = vmax.f32 %v2609_v46, 0.0  ;;  %v2903_v2 = vsub.f32 %v2901_v55, %v2902_v3 }
 0x2de   :  { %v2853_v60 = vand.u32 4294901760, %v2620_v6  ;;  %v2904_v50 = vand.u32 4294901760, %v2903_v2 }
 0x2e0   :  { %v2895_v22 = vsub.f32 %v2620_v6, %v2853_v60 }
 0x2e1   :  { %v2612_v25 = vpop.f32.mrf.mxu3 }
 0x2e2   :  { %v2613_v52 = vadd.f32 %v2612_v25, %v2564_v15  ;;  %v2896_v27 = vand.u32 4294901760, %v2895_v22 }
 0x2e4   :  { %v2622_v51 = vmax.f32 %v2613_v52, 0.0  ;;  %v2897_v31 = vsub.f32 %v2895_v22, %v2896_v27 }
 0x2e6   :  { %v2851_v39 = vand.u32 4294901760, %v2622_v51  ;;  %v2898_v42 = vand.u32 4294901760, %v2897_v31 }
 0x2e8   :  { %v2889_v30 = vsub.f32 %v2622_v51, %v2851_v39  ;;  %2852 = vmatpush.msra.mxu2 %v2851_v39  ;;  %2969 = vmatpush.msrb.mxu1 %v2851_v39 }
 0x2ea   :  { %v2890_v40 = vand.u32 4294901760, %v2889_v30  ;;  %2854 = vmatpush.msra.mxu2 %v2853_v60  ;;  %2935 = vmatpush.msrb.mxu0 %v2889_v30 }
 0x2eb   :  { %2971 = vmatpush.msrb.mxu1 %v2853_v60 }
 0x2ec   :  { %v2891_v11 = vsub.f32 %v2889_v30, %v2890_v40  ;;  %2856 = vmatpush.msra.mxu2 %v2855_v38  ;;  %2938 = vmatpush.msrb.mxu0 %v2895_v22 }
 0x2ed   :  { %2973 = vmatpush.msrb.mxu1 %v2855_v38 }
 0x2ee   :  { %2858 = vmatpush.msra.mxu2 %v2857_v4  ;;  %2941 = vmatpush.msrb.mxu0 %v2901_v55  ;;  %v2892_v43 = vand.u32 4294901760, %v2891_v11 }
 0x2ef   :  { %2975 = vmatpush.msrb.mxu1 %v2857_v4  ;;  %2864 = vmatmul.f32.vlgmr.msra.gmra.mxu2 %v5059_v23 }
 0x2f0   :  { %3004 = vmatpush.msrb.mxu2 %v2890_v40  ;;  %2893 = vmatpush.msra.mxu3 %v2892_v43 }
 0x2f1   :  { %2944 = vmatpush.msrb.mxu0 %v2907_v33  ;;  %2979 = vmatmul.f32.vlgmr.msrb.gmra.mxu1 %v5060_v0 }
 0x2f2   :  { %3008 = vmatpush.msrb.mxu2 %v2896_v27  ;;  %2947 = vmatmul.f32.vlgmr.msrb.gmra.mxu0 %v5058_v45 }
 0x2f3   :  { %2899 = vmatpush.msra.mxu3 %v2898_v42 }
 0x2f4   :  { %3012 = vmatpush.msrb.mxu2 %v2902_v3 }
 0x2f5   :  { %2905 = vmatpush.msra.mxu3 %v2904_v50 }
 0x2f6   :  { %3016 = vmatpush.msrb.mxu2 %v2908_v44 }
 0x2f7   :  { %2911 = vmatpush.msra.mxu3 %v2910_v10  ;;  %2872 = vmatmul.f32.gmra.mxu2 %v5063_v18 }
 0x2f8   :  { %2913 = vmatmul.f32.vlgmr.msra.gmra.mxu3 %v5061_v1 }
 0x2f9   :  { %3039 = vmatpush.msrb.mxu3 %v2851_v39  ;;  %2985 = vmatmul.f32.gmra.mxu1 %v5064_v7 }
 0x2fa   :  { %2952 = vmatmul.f32.gmra.mxu0 %v5062_v21 }
 0x2fb   :  { %3041 = vmatpush.msrb.mxu3 %v2853_v60 }
 0x2fd   :  { %3043 = vmatpush.msrb.mxu3 %v2855_v38 }
 0x2ff   :  { %3045 = vmatpush.msrb.mxu3 %v2857_v4  ;;  %3018 = vmatmul.f32.vlgmr.msrb.gmra.mxu2 %v5061_v1 }
 0x300   :  { %2917 = vmatmul.f32.gmra.mxu3 %v5065_v56 }
 0x307   :  { %3022 = vmatmul.f32.gmra.mxu2 %v5065_v56 }
 0x308   :  { %3047 = vmatmul.f32.vlgmr.msrb.gmra.mxu3 %v5061_v1 }
 0x310   :  { %3051 = vmatmul.f32.gmra.mxu3 %v5065_v56 }
 0x31a   :  { %v2649_v45 = vpop.f32.mrf.mxu0 }
 0x31b   :  { %v2650_v8 = vadd.f32 %v2649_v45, %v4519_v12 }
 0x322   :  { %v2657_v0 = vpop.f32.mrf.mxu0  ;;  %v2764_v18 = vpop.f32.mrf.mxu3 }
 0x323   :  { %v2698_v23 = vpop.f32.mrf.mxu1  ;;  %v2732_v21 = vpop.f32.mrf.mxu2  ;;  %v2658_v7 = vadd.f32 %v2657_v0, %v4560_v49 }
 0x324   :  { %v2699_v32 = vadd.f32 %v2698_v23, %v2650_v8 }
 0x326   :  { %v2733_v54 = vadd.f32 %v2732_v21, %v2699_v32 }
 0x328   :  { %v2765_v26 = vadd.f32 %v2764_v18, %v2733_v54 }
 0x32a   :  { %v2803_v61 = vpop.f32.mrf.mxu0  ;;  %v2770_v34 = vpop.f32.mrf.mxu3 }
 0x32b   :  { %v2702_v36 = vpop.f32.mrf.mxu1  ;;  %v2737_v19 = vpop.f32.mrf.mxu2  ;;  %v2804_v53 = vadd.f32 %v2803_v61, %v2765_v26 }
 0x32c   :  { %v2703_v41 = vadd.f32 %v2702_v36, %v2658_v7 }
 0x32e   :  { %v2738_v1 = vadd.f32 %v2737_v19, %v2703_v41 }
 0x330   :  { %v2771_v37 = vadd.f32 %v2770_v34, %v2738_v1 }
 0x332   :  { %v2807_v56 = vpop.f32.mrf.mxu0 }
 0x333   :  { %v2832_v17 = vpop.f32.mrf.mxu1  ;;  %v2808_v16 = vadd.f32 %v2807_v56, %v2771_v37 }
 0x334   :  { %v2833_v13 = vadd.f32 %v2832_v17, %v2804_v53 }
 0x336   :  { %v3055_v47 = vmax.f32 %v2833_v13, 0.0 }
 0x338   :  { %v3059_v28 = vmul.f32 %v3055_v47, %v4668_v24 }
 0x33b   :  { %v2836_v59 = vpop.f32.mrf.mxu1 }
 0x33c   :  { %v2837_v63 = vadd.f32 %v2836_v59, %v2808_v16 }
 0x33e   :  { %v3057_v20 = vmax.f32 %v2837_v63, 0.0 }
 0x340   :  { %v3061_v46 = vmul.f32 %v3057_v20, %v4661_v57 }
 0x342   :  { %v3063_v6 = vadd.f32 %v3061_v46, %v3059_v28 }
 0x344   :  { %v3064_v48 = vrot.slane %v3063_v6, 4 }
 0x346   :  { %v3065_v60 = vadd.f32 %v3064_v48, %v3063_v6 }
 0x348   :  { %v3066_v22 = vrot.slane %v3065_v60, 2 }
 0x34a   :  { %v3067_v30 = vadd.f32 %v3066_v22, %v3065_v60 }
 0x34c   :  { %v3068_v31 = vrot.slane %v3067_v30, 1 }
 0x34e   :  { %v3069_v42 = vadd.f32 %v3068_v31, %v3067_v30 }
 0x350   :  { %v3077_v45 = vadd.f32 %v3069_v42, %v4716_v5 }
 0x352   :  { %v3141_v36 = vmul.f32 -1.442695, %v3077_v45 }
 0x354   :  { %3156 = vpow2.f32 %v3141_v36 }
 0x35a   :  { %v3157_v19 = vpop.eup %3156 }
 0x35b   :  { %v3085_v1 = vadd.f32 1.0, %v3157_v19 }
 0x35d   :  { %3158 = vrcp.f32 %v3085_v1  ;;  %vm3092_vm14 = vweird.f32 %v3085_v1  ;;  %v3096_v28 = vand.u32 2147483647, %v3085_v1 }
 0x35f   :  { %vm3097_vm3 = vcmp.eq.f32.partialorder %v3096_v28, 8.507059e+37 }
 0x363   :  { %v3159_v37 = vpop.eup %3158 }
 0x364   :  { %vm3093_vm12 = vweird.f32 %v3159_v37 }
 0x365   :  { %vm4836_vm15 = vmor %vm3092_vm14, %vm3093_vm12 }
 0x36e   :  { %v2980_v38 = vpop.f32.mrf.mxu1 }
 0x36f   :  { %v2948_v14 = vpop.f32.mrf.mxu0 }
 0x372   :  { %v2865_v35 = vpop.f32.mrf.mxu2 }
 0x373   :  { %v2866_v15 = vadd.f32 %v2865_v35, %v4519_v12 }
 0x376   :  { %v2986_v11 = vpop.f32.mrf.mxu1 }
 0x377   :  { %v2953_v33 = vpop.f32.mrf.mxu0 }
 0x37a   :  { %v2873_v29 = vpop.f32.mrf.mxu2 }
 0x37b   :  { %v2914_v62 = vpop.f32.mrf.mxu3  ;;  %v2874_v4 = vadd.f32 %v2873_v29, %v4560_v49 }
 0x37c   :  { %v2915_v52 = vadd.f32 %v2914_v62, %v2866_v15 }
 0x37e   :  { %v2949_v39 = vadd.f32 %v2948_v14, %v2915_v52 }
 0x380   :  { %v2981_v40 = vadd.f32 %v2980_v38, %v2949_v39 }
 0x382   :  { %v3019_v51 = vpop.f32.mrf.mxu2 }
 0x383   :  { %v2918_v25 = vpop.f32.mrf.mxu3  ;;  %v3020_v44 = vadd.f32 %v3019_v51, %v2981_v40 }
 0x384   :  { %v2919_v55 = vadd.f32 %v2918_v25, %v2874_v4 }
 0x386   :  { %v2954_v3 = vadd.f32 %v2953_v33, %v2919_v55 }
 0x388   :  { %v2987_v2 = vadd.f32 %v2986_v11, %v2954_v3 }
 0x38a   :  { %v3023_v43 = vpop.f32.mrf.mxu2 }
 0x38b   :  { %v3048_v27 = vpop.f32.mrf.mxu3  ;;  %v3024_v9 = vadd.f32 %v3023_v43, %v2987_v2 }
 0x38c   :  { %v3049_v12 = vadd.f32 %v3048_v27, %v3020_v44 }
 0x38e   :  { %v3056_v10 = vmax.f32 %v3049_v12, 0.0 }
 0x390   :  { %v3060_v0 = vmul.f32 %v3056_v10, %v4668_v24 }
 0x393   :  { %v3052_v50 = vpop.f32.mrf.mxu3 }
 0x394   :  { %v3053_v49 = vadd.f32 %v3052_v50, %v3024_v9 }
 0x396   :  { %v3058_v23 = vmax.f32 %v3053_v49, 0.0 }
 0x398   :  { %v3062_v21 = vmul.f32 %v3058_v23, %v4661_v57  ;;  %v3088_v57 = vmul.f32 %v3159_v37, %v3085_v1 }
 0x39a   :  { %v3070_v18 = vadd.f32 %v3062_v21, %v3060_v0  ;;  %v3089_v26 = vsub.f32 1.0, %v3088_v57 }
 0x39c   :  { %v3071_v7 = vrot.slane %v3070_v18, 4  ;;  %v3090_v59 = vmul.f32 %v3159_v37, %v3089_v26 }
 0x39e   :  { %v3072_v8 = vadd.f32 %v3071_v7, %v3070_v18  ;;  %v3091_v20 = vadd.f32 %v3159_v37, %v3090_v59 }
 0x3a0   :  { %v3073_v61 = vrot.slane %v3072_v8, 2  ;;  %v3095_v48 = vsel %vm4836_vm15, %v3159_v37, %v3091_v20 }
 0x3a2   :  { %v3074_v41 = vadd.f32 %v3073_v61, %v3072_v8 }
 0x3a4   :  { %v3075_v32 = vrot.slane %v3074_v41, 1 }
 0x3a6   :  { %v3076_v17 = vadd.f32 %v3075_v32, %v3074_v41 }
 0x3a8   :  { %v3078_v34 = vadd.f32 %v3076_v17, %v4716_v5  ;;  %v3098_v5 = vand.u32 2147483648, %v3085_v1 }
 0x3aa   :  { %v3142_v54 = vmul.f32 -1.442695, %v3078_v34  ;;  %v3099_v14 = vor.u32 1.1754944e-38, %v3098_v5 }
 0x3ac   :  { %3160 = vpow2.f32 %v3142_v54  ;;  %v3100_v25 = vsel %vm3097_vm3, %v3099_v14, %v3095_v48 }
 0x3b2   :  { %v3161_v24 = vpop.eup %3160 }
 0x3b3   :  { %v3086_v56 = vadd.f32 1.0, %v3161_v24 }
 0x3b5   :  { %3162 = vrcp.f32 %v3086_v56  ;;  %v3113_v13 = vand.u32 2147483648, %v3086_v56  ;;  %v3111_v46 = vand.u32 2147483647, %v3086_v56  ;;  %vm3107_vm0 = vweird.f32 %v3086_v56 }
 0x3b7   :  { %v3114_v62 = vor.u32 1.1754944e-38, %v3113_v13  ;;  %vm3112_vm2 = vcmp.eq.f32.partialorder %v3111_v46, 8.507059e+37 }
 0x3bb   :  { %v3163_v16 = vpop.eup %3162 }
 0x3bc   :  { %v3103_v53 = vmul.f32 %v3163_v16, %v3086_v56  ;;  %vm3108_vm13 = vweird.f32 %v3163_v16 }
 0x3bd   :  { %vm3109_vm1 = vmor %vm3107_vm0, %vm3108_vm13 }
 0x3be   :  { %v3104_v63 = vsub.f32 1.0, %v3103_v53 }
 0x3c0   :  { %v3105_v47 = vmul.f32 %v3163_v16, %v3104_v63 }
 0x3c2   :  { %v3106_v6 = vadd.f32 %v3163_v16, %v3105_v47 }
 0x3c4   :  { %v3110_v29 = vsel %vm3109_vm1, %v3163_v16, %v3106_v6 }
 0x3c5   :  { %v3115_v15 = vsel %vm3112_vm2, %v3114_v62, %v3110_v29 }
 0x3c6   :  { %v3119_v60 = vrot.slane %v3115_v15, 7 }
 0x3c8   :  { %v3120_v38 = vsel %vm1611_vm9, %v3100_v25, %v3119_v60 }
 0x3c9   :  { %3122 = vst.msk [vmem:[#allocation3 + $0x2] sm:$0x3] %vm4781_vm11, %v3120_v38 }
 0x3ca   :  { %3133 = dma.vmem_to_hbm [thread:$0]  %s3129_s22, 64, %s3131_s25, [#allocation4]  }
 0x3cb   :  { %3188 = dma.done.wait [#allocation4], 64  }
 0x3cc   :  { %3189 = vsyncadd [#allocation4], 4294967232 }
 0x3cd   :  { %3138 = vsyncpa [#allocation4], 1 }

</bundles_post_ra>
